<compile_context>
chip_gen: v7x
topology: tpu7x:2x2x1
jax: 0.10.0
libtpu: 0.0.40
codegen_flags: <defaults>
</compile_context>

<pallas_src>
import functools

import jax
import jax.numpy as jnp
from jax import lax
from jax.experimental import pallas as pl
from jax.experimental.pallas import tpu as pltpu

PAD = 0


def _round_up(x, m):
    return ((x + m - 1) // m) * m


def _gru_decoder_kernel(emb_ref, h0_ref, wih_ref, whh_ref, bgi_ref, bhn_ref,
                        wout_ref, bout_ref, out_ref, hT_ref,
                        h_carry, hs_ref, gi_ref, *, t_valid):
    """One (batch-tile, T-chunk, vocab-tile) grid step of the GRU decoder.

    emb_ref : (TC, BT, Hp)   cd    embedded inputs for this chunk
    h0_ref  : (BT, Hp)       f32   initial hidden for this batch tile
    wih_ref : (Hp, 3Hp)      cd    gate blocks r|z|n at 128-aligned offsets
    whh_ref : (Hp, 3Hp)      cd
    bgi_ref : (1, 3Hp)       f32   b_ih with the r/z parts of b_hh folded in
    bhn_ref : (1, Hp)        f32   b_hn (kept separate: PyTorch does r*(gh_n+b_hn))
    wout_ref: (Hp, VT)       cd    vocab tile of the output projection
    bout_ref: (1, VT)        f32
    out_ref : (TC, BT, VT)   f32   logits tile
    hT_ref  : (BT, Hp)       f32   final hidden
    h_carry : (BT, Hp)       f32   VMEM scratch, hidden carried across T chunks
    hs_ref  : (TC, BT, Hp)   cd    VMEM scratch, per-step hidden states (persist over v)
    gi_ref  : (TC, BT, 3Hp)  f32   VMEM scratch, precomputed input gates
    t_valid : static int, number of real (unpadded) timesteps
    """
    t_idx = pl.program_id(1)
    v_idx = pl.program_id(2)
    TC, BT, Hp = hs_ref.shape
    VT = out_ref.shape[2]

    # ---- recurrence: only on the first vocab tile; hs/h_carry persist over v ----
    @pl.when(v_idx == 0)
    def _recurrence():
        @pl.when(t_idx == 0)
        def _init():
            h_carry[...] = h0_ref[...]

        # Hoisted input-path matmul for the whole chunk (bf16 MXU, f32 accumulate),
        # with the folded bias; parked in VMEM scratch off the serial path.
        gi_ref[...] = (
            jnp.dot(emb_ref[...].reshape(TC * BT, Hp), wih_ref[...],
                    preferred_element_type=jnp.float32) + bgi_ref[...]
        ).reshape(TC, BT, 3 * Hp)

        w_hh = whh_ref[...]
        b_hn = jnp.broadcast_to(bhn_ref[...], (BT, Hp))   # hoisted broadcast
        t0 = t_idx * TC

        def make_step(masked):
            def step(i, h):
                gi = gi_ref[i]                                           # (BT, 3Hp)
                gh = jnp.dot(h.astype(w_hh.dtype), w_hh,
                             preferred_element_type=jnp.float32)
                # PyTorch GRU gate order: reset, update, new (lane-aligned slices).
                r = jax.nn.sigmoid(gi[:, 0:Hp] + gh[:, 0:Hp])
                z = jax.nn.sigmoid(gi[:, Hp:2 * Hp] + gh[:, Hp:2 * Hp])
                n = jnp.tanh(gi[:, 2 * Hp:3 * Hp] + r * (gh[:, 2 * Hp:3 * Hp] + b_hn))
                h_new = (1.0 - z) * n + z * h
                if masked:
                    # Padded timesteps in the tail chunk: keep h unchanged there.
                    m = (t0 + i < t_valid).astype(jnp.float32)
                    h_new = m * h_new + (1.0 - m) * h
                hs_ref[i] = h_new.astype(hs_ref.dtype)
                return h_new
            return step

        h_in = h_carry[...]
        if t_valid % TC == 0:
            # No padded timesteps anywhere: single unmasked loop.
            h_carry[...] = lax.fori_loop(0, TC, make_step(False), h_in, unroll=True)
        else:
            # Mask only on the last T chunk; all other chunks take the cheap path.
            last_t = t_idx == pl.num_programs(1) - 1

            @pl.when(jnp.logical_not(last_t))
            def _full():
                h_carry[...] = lax.fori_loop(0, TC, make_step(False), h_in,
                                             unroll=True)

            @pl.when(last_t)
            def _tail():
                h_carry[...] = lax.fori_loop(0, TC, make_step(True), h_in,
                                             unroll=True)

    # ---- output projection for this vocab tile (runs for every v) ----
    logits = (jnp.dot(hs_ref[...].reshape(TC * BT, Hp), wout_ref[...],
                      preferred_element_type=jnp.float32) + bout_ref[...])
    out_ref[...] = logits.reshape(TC, BT, VT)

    # Robust final-hidden write: cheap VMEM store every grid step.
    hT_ref[...] = h_carry[...]


def decoder_forward(seqs, hidden, params, *, t_chunk=16, b_tile=None, v_tile=None,
                    compute_dtype=jnp.bfloat16):
    """Mirror of Decoder.forward(seqs, hidden).

    seqs   : (T, B) int32 token ids (seq-first, like nn.GRU batch_first=False)
    hidden : (1, B, H) float32 initial GRU hidden state
    returns (output (T, B, V) f32, hidden (1, B, H) f32)
    """
    emb_table = params["embedding"]        # (V, H), row PAD is zero
    w_ih = params["w_ih"]                  # (H, 3H)  gate order r, z, n
    w_hh = params["w_hh"]                  # (H, 3H)
    b_ih = params["b_ih"]                  # (1, 3H)
    b_hh = params["b_hh"]                  # (1, 3H)
    w_out = params["w_out"]                # (H, V)
    b_out = params["b_out"]                # (1, V)

    T, B = seqs.shape
    V, H = emb_table.shape
    cd = jnp.dtype(compute_dtype)

    # ---- tiling choices (perf review) ----
    sub = 8 if cd.itemsize >= 4 else 16    # sublane granularity for cd blocks
    if b_tile is None:
        # Fill the MXU M dimension on the serial gh matmul (cap at 128).
        # Note (v7x): for very large batches prefer b_tile = Bp/2 so the
        # "parallel" batch axis still splits across the 2 TensorCores.
        b_tile = min(128, _round_up(B, sub))
    b_tile = max(sub, _round_up(b_tile, sub))
    if v_tile is None:
        v_tile = min(_round_up(V, 128), 512)
    v_tile = _round_up(v_tile, 128)

    Hp = _round_up(H, 128)
    Vp = _round_up(V, v_tile)
    Bp = _round_up(B, b_tile)
    Tp = _round_up(T, t_chunk)

    # Glue: embedding lookup (gather) in plain JAX, carried in the compute dtype.
    # TODO(synk): fuse the gather into the kernel to avoid this HBM round trip.
    emb = jnp.take(emb_table, seqs, axis=0).astype(cd)                  # (T, B, H)
    emb_p = jnp.zeros((Tp, Bp, Hp), cd).at[:T, :B, :H].set(emb)
    h0_p = jnp.zeros((Bp, Hp), jnp.float32).at[:B, :H].set(
        hidden[0].astype(jnp.float32))

    # Pad recurrent weights with each gate block at a 128-aligned offset so the
    # in-kernel r/z/n slices are lane-aligned; extra rows/cols are zero so padded
    # lanes of h stay exactly zero through the recurrence.
    def pad_gate_w(w):
        out = jnp.zeros((Hp, 3 * Hp), jnp.float32)
        for g in range(3):
            out = out.at[:H, g * Hp:g * Hp + H].set(w[:, g * H:(g + 1) * H])
        return out.astype(cd)

    # Fold the r/z parts of b_hh into the input-path bias; b_hn stays separate
    # because PyTorch computes n = tanh(gi_n + r * (gh_n + b_hn)).
    b_gi = jnp.zeros((1, 3 * Hp), jnp.float32)
    b_gi = b_gi.at[:, 0:H].set(b_ih[:, 0:H] + b_hh[:, 0:H])
    b_gi = b_gi.at[:, Hp:Hp + H].set(b_ih[:, H:2 * H] + b_hh[:, H:2 * H])
    b_gi = b_gi.at[:, 2 * Hp:2 * Hp + H].set(b_ih[:, 2 * H:3 * H])
    b_hn_p = jnp.zeros((1, Hp), jnp.float32).at[:, :H].set(b_hh[:, 2 * H:3 * H])

    w_ih_p = pad_gate_w(w_ih)
    w_hh_p = pad_gate_w(w_hh)
    w_out_p = jnp.zeros((Hp, Vp), jnp.float32).at[:H, :V].set(w_out).astype(cd)
    b_out_p = jnp.zeros((1, Vp), jnp.float32).at[:, :V].set(b_out)

    n_b = Bp // b_tile
    n_t = Tp // t_chunk
    n_v = Vp // v_tile

    kernel = functools.partial(_gru_decoder_kernel, t_valid=T)

    out_p, hT_p = pl.pallas_call(
        kernel,
        out_shape=(
            jax.ShapeDtypeStruct((Tp, Bp, Vp), jnp.float32),
            jax.ShapeDtypeStruct((Bp, Hp), jnp.float32),
        ),
        grid_spec=pltpu.PrefetchScalarGridSpec(
            num_scalar_prefetch=0,
            grid=(n_b, n_t, n_v),
            in_specs=[
                pl.BlockSpec((t_chunk, b_tile, Hp), lambda b, t, v: (t, b, 0)),  # emb
                pl.BlockSpec((b_tile, Hp), lambda b, t, v: (b, 0)),              # h0
                pl.BlockSpec((Hp, 3 * Hp), lambda b, t, v: (0, 0)),              # w_ih
                pl.BlockSpec((Hp, 3 * Hp), lambda b, t, v: (0, 0)),              # w_hh
                pl.BlockSpec((1, 3 * Hp), lambda b, t, v: (0, 0)),               # b_gi
                pl.BlockSpec((1, Hp), lambda b, t, v: (0, 0)),                   # b_hn
                pl.BlockSpec((Hp, v_tile), lambda b, t, v: (0, v)),              # w_out
                pl.BlockSpec((1, v_tile), lambda b, t, v: (0, v)),               # b_out
            ],
            out_specs=(
                pl.BlockSpec((t_chunk, b_tile, v_tile),
                             lambda b, t, v: (t, b, v)),                         # logits
                pl.BlockSpec((b_tile, Hp), lambda b, t, v: (b, 0)),              # hT
            ),
            scratch_shapes=[
                pltpu.VMEM((b_tile, Hp), jnp.float32),               # h carry (f32)
                pltpu.VMEM((t_chunk, b_tile, Hp), cd),               # hidden states
                pltpu.VMEM((t_chunk, b_tile, 3 * Hp), jnp.float32),  # GI chunk
            ],
        ),
        compiler_params=pltpu.CompilerParams(
            dimension_semantics=("parallel", "arbitrary", "arbitrary"),
            vmem_limit_bytes=48 * 1024 * 1024),
    )(emb_p, h0_p, w_ih_p, w_hh_p, b_gi, b_hn_p, w_out_p, b_out_p)

    return out_p[:T, :B, :V], hT_p[None, :B, :H]


def init_decoder_params(key, hidden_size, output_size):
    """Deterministic parameter init mimicking PyTorch default shapes."""
    k_emb, k_ih, k_hh, k_bih, k_bhh, k_out, k_bout = jax.random.split(key, 7)
    bound = 1.0 / jnp.sqrt(hidden_size)

    emb = jax.random.normal(k_emb, (output_size, hidden_size), jnp.float32)
    emb = emb.at[PAD].set(0.0)  # padding_idx=PAD -> zero row

    def u(k, shape):
        return jax.random.uniform(k, shape, jnp.float32, -bound, bound)

    # PyTorch stores weight_ih_l0 as (3H, H); we pass the transpose (H, 3H).
    w_ih = u(k_ih, (hidden_size, 3 * hidden_size))
    w_hh = u(k_hh, (hidden_size, 3 * hidden_size))
    b_ih = u(k_bih, (1, 3 * hidden_size))
    b_hh = u(k_bhh, (1, 3 * hidden_size))
    # nn.Linear(hidden, output): weight (V, H); we pass transpose (H, V).
    w_out = u(k_out, (hidden_size, output_size))
    b_out = u(k_bout, (1, output_size))

    return {
        "embedding": emb,
        "w_ih": w_ih, "w_hh": w_hh, "b_ih": b_ih, "b_hh": b_hh,
        "w_out": w_out, "b_out": b_out,
    }


def _reference_forward(seqs, hidden, params, compute_dtype=jnp.float32):
    """Pure-JAX reference with PyTorch GRU semantics.

    When compute_dtype is bf16 it mirrors the kernel's rounding points (weights
    and emb cast to bf16; h rounded to bf16 only at the two matmul inputs) so the
    numerical comparison stays tight while the math stays identical.
    """
    H = params["w_hh"].shape[0]

    def q(x):
        return x.astype(compute_dtype).astype(jnp.float32)

    emb = q(jnp.take(params["embedding"], seqs, axis=0))
    w_ih, w_hh, w_out = q(params["w_ih"]), q(params["w_hh"]), q(params["w_out"])
    b_ih, b_hh, b_out = params["b_ih"], params["b_hh"], params["b_out"]

    h = hidden[0]
    outs = []
    for t in range(seqs.shape[0]):
        x = emb[t]
        gi = x @ w_ih + b_ih
        gh = q(h) @ w_hh + b_hh
        r = jax.nn.sigmoid(gi[:, :H] + gh[:, :H])
        z = jax.nn.sigmoid(gi[:, H:2 * H] + gh[:, H:2 * H])
        n = jnp.tanh(gi[:, 2 * H:] + r * gh[:, 2 * H:])
        h = (1.0 - z) * n + z * h
        outs.append(q(h) @ w_out + b_out)
    return jnp.stack(outs, axis=0), h[None]


if __name__ == "__main__":
    key = jax.random.PRNGKey(0)
    T, B, H, V = 8, 4, 32, 192   # seq, batch, hidden_size, output_size (vocab)

    k_params, k_seq, k_h, k_seq2 = jax.random.split(key, 4)
    params = init_decoder_params(k_params, H, V)

    seqs = jax.random.randint(k_seq, (T, B), 0, V, dtype=jnp.int32)
    seqs = seqs.at[-1, :].set(PAD)  # include some PAD tokens
    hidden = jax.random.normal(k_h, (1, B, H), jnp.float32)

    # 1) bf16 fast path: 2 T-chunks (h carried across the grid) and 2 vocab tiles
    #    (exercises the decoupled projection axis).
    out, h_t = decoder_forward(seqs, hidden, params, t_chunk=4, v_tile=128,
                               compute_dtype=jnp.bfloat16)
    out = jax.block_until_ready(out)
    h_t = jax.block_until_ready(h_t)
    assert out.shape == (T, B, V) and h_t.shape == (1, B, H)
    ref_out, ref_h = _reference_forward(seqs, hidden, params,
                                        compute_dtype=jnp.bfloat16)
    assert jnp.allclose(out, ref_out, atol=5e-3, rtol=5e-3)
    assert jnp.allclose(h_t, ref_h, atol=5e-3, rtol=5e-3)

    # 2) f32 exactness check against the PyTorch-order reference.
    out32, h32 = decoder_forward(seqs, hidden, params, t_chunk=4,
                                 compute_dtype=jnp.float32)
    out32 = jax.block_until_ready(out32)
    ref32, refh32 = _reference_forward(seqs, hidden, params,
                                       compute_dtype=jnp.float32)
    assert jnp.allclose(out32, ref32, atol=1e-4, rtol=1e-4)
    assert jnp.allclose(h32, refh32, atol=1e-4, rtol=1e-4)

    # 3) Tail-chunk path: T not a multiple of t_chunk (mask on last chunk only).
    T2 = 6
    seqs2 = jax.random.randint(k_seq2, (T2, B), 0, V, dtype=jnp.int32)
    out2, h_t2 = decoder_forward(seqs2, hidden, params, t_chunk=4,
                                 compute_dtype=jnp.bfloat16)
    out2 = jax.block_until_ready(out2)
    h_t2 = jax.block_until_ready(h_t2)
    ref_out2, ref_h2 = _reference_forward(seqs2, hidden, params,
                                          compute_dtype=jnp.bfloat16)
    assert jnp.allclose(out2, ref_out2, atol=5e-3, rtol=5e-3)
    assert jnp.allclose(h_t2, ref_h2, atol=5e-3, rtol=5e-3)

    print("KERNEL_OK")
</pallas_src>

<mosaic_0001>
module attributes {stable_mosaic.version = 11 : i64} {
  func.func @_gru_decoder_kernel(%arg0: i32, %arg1: i32, %arg2: i32, %arg3: memref<4x16x128xbf16, #tpu.memory_space<vmem>>, %arg4: memref<16x128xf32, #tpu.memory_space<vmem>>, %arg5: memref<128x384xbf16, #tpu.memory_space<vmem>>, %arg6: memref<128x384xbf16, #tpu.memory_space<vmem>>, %arg7: memref<1x384xf32, #tpu.memory_space<vmem>>, %arg8: memref<1x128xf32, #tpu.memory_space<vmem>>, %arg9: memref<128x128xbf16, #tpu.memory_space<vmem>>, %arg10: memref<1x128xf32, #tpu.memory_space<vmem>>, %arg11: memref<4x16x128xf32, #tpu.memory_space<vmem>>, %arg12: memref<16x128xf32, #tpu.memory_space<vmem>>, %arg13: memref<16x128xf32, #tpu.memory_space<vmem>>, %arg14: memref<4x16x128xbf16, #tpu.memory_space<vmem>>, %arg15: memref<4x16x384xf32, #tpu.memory_space<vmem>>) attributes {dimension_semantics = [#tpu.dimension_semantics<parallel>, #tpu.dimension_semantics<arbitrary>, #tpu.dimension_semantics<arbitrary>], iteration_bounds = array<i64: 1, 2, 2>, scalar_prefetch = 0 : i64, scratch_operands = 3 : i64, tpu.core_type = #tpu.core_type<tc>, window_params = [{transform_indices = @transform_0, window_bounds = array<i64: 4, 16, 128>}, {transform_indices = @transform_1, window_bounds = array<i64: 16, 128>}, {pipeline_mode = #tpu.pipeline_mode<synchronous>, transform_indices = @transform_2, window_bounds = array<i64: 128, 384>}, {pipeline_mode = #tpu.pipeline_mode<synchronous>, transform_indices = @transform_3, window_bounds = array<i64: 128, 384>}, {pipeline_mode = #tpu.pipeline_mode<synchronous>, transform_indices = @transform_4, window_bounds = array<i64: 1, 384>}, {pipeline_mode = #tpu.pipeline_mode<synchronous>, transform_indices = @transform_5, window_bounds = array<i64: 1, 128>}, {transform_indices = @transform_6, window_bounds = array<i64: 128, 128>}, {transform_indices = @transform_7, window_bounds = array<i64: 1, 128>}, {transform_indices = @transform_8, window_bounds = array<i64: 4, 16, 128>}, {transform_indices = @transform_9, window_bounds = array<i64: 16, 128>}]} {
    %c0_i32 = arith.constant 0 : i32
    %0 = arith.cmpi eq, %arg2, %c0_i32 : i32
    %1 = arith.extui %0 : i1 to i32
    %c0_i32_0 = arith.constant 0 : i32
    %2 = arith.cmpi ne, %1, %c0_i32_0 : i32
    scf.if %2 {
      %c0_i32_14 = arith.constant 0 : i32
      %14 = arith.cmpi eq, %arg1, %c0_i32_14 : i32
      %15 = arith.extui %14 : i1 to i32
      %c0_i32_15 = arith.constant 0 : i32
      %16 = arith.cmpi ne, %15, %c0_i32_15 : i32
      scf.if %16 {
        %c0_68 = arith.constant 0 : index
        %c0_69 = arith.constant 0 : index
        %180 = vector.load %arg4[%c0_68, %c0_69] : memref<16x128xf32, #tpu.memory_space<vmem>>, vector<16x128xf32>
        %c0_70 = arith.constant 0 : index
        %c0_71 = arith.constant 0 : index
        %181 = vector.load %arg13[%c0_70, %c0_71] : memref<16x128xf32, #tpu.memory_space<vmem>>, vector<16x128xf32>
        tpu.vector_store %arg13[%c0_70, %c0_71], %180 {strides = array<i32>} : memref<16x128xf32, #tpu.memory_space<vmem>>, vector<16x128xf32>,
      } else {
      }
      %c0_16 = arith.constant 0 : index
      %c0_17 = arith.constant 0 : index
      %c0_18 = arith.constant 0 : index
      %17 = vector.load %arg3[%c0_16, %c0_17, %c0_18] : memref<4x16x128xbf16, #tpu.memory_space<vmem>>, vector<4x16x128xbf16>
      %18 = vector.shape_cast %17 : vector<4x16x128xbf16> to vector<64x128xbf16>
      %c0_19 = arith.constant 0 : index
      %c0_20 = arith.constant 0 : index
      %19 = vector.load %arg5[%c0_19, %c0_20] : memref<128x384xbf16, #tpu.memory_space<vmem>>, vector<128x384xbf16>
      %cst_21 = arith.constant dense<0.000000e+00> : vector<64x384xf32>
      %20 = tpu.matmul %18, %19, %cst_21 {dimension_numbers = #tpu.dot_dimension_numbers<[1], [0], [0], [1], [0, 0, 1, 1], [], []>} : vector<64x128xbf16>, vector<128x384xbf16>, vector<64x384xf32> -> vector<64x384xf32>
      %c0_22 = arith.constant 0 : index
      %c0_23 = arith.constant 0 : index
      %21 = vector.load %arg7[%c0_22, %c0_23] : memref<1x384xf32, #tpu.memory_space<vmem>>, vector<1x384xf32>
      %22 = vector.broadcast %21 : vector<1x384xf32> to vector<64x384xf32>
      %23 = arith.addf %20, %22 : vector<64x384xf32>
      %24 = vector.shape_cast %23 : vector<64x384xf32> to vector<4x16x384xf32>
      %c0_24 = arith.constant 0 : index
      %c0_25 = arith.constant 0 : index
      %c0_26 = arith.constant 0 : index
      %25 = vector.load %arg15[%c0_24, %c0_25, %c0_26] : memref<4x16x384xf32, #tpu.memory_space<vmem>>, vector<4x16x384xf32>
      tpu.vector_store %arg15[%c0_24, %c0_25, %c0_26], %24 {strides = array<i32>} : memref<4x16x384xf32, #tpu.memory_space<vmem>>, vector<4x16x384xf32>,
      %c0_27 = arith.constant 0 : index
      %c0_28 = arith.constant 0 : index
      %26 = vector.load %arg6[%c0_27, %c0_28] : memref<128x384xbf16, #tpu.memory_space<vmem>>, vector<128x384xbf16>
      %c0_29 = arith.constant 0 : index
      %c0_30 = arith.constant 0 : index
      %27 = vector.load %arg8[%c0_29, %c0_30] : memref<1x128xf32, #tpu.memory_space<vmem>>, vector<1x128xf32>
      %28 = vector.shape_cast %27 : vector<1x128xf32> to vector<1x128xf32>
      %29 = vector.broadcast %28 : vector<1x128xf32> to vector<16x128xf32>
      %c0_31 = arith.constant 0 : index
      %c0_32 = arith.constant 0 : index
      %30 = vector.load %arg13[%c0_31, %c0_32] : memref<16x128xf32, #tpu.memory_space<vmem>>, vector<16x128xf32>
      %c0_i32_33 = arith.constant 0 : i32
      %31 = arith.index_cast %c0_i32_33 : i32 to index
      %c0_34 = arith.constant 0 : index
      %c0_35 = arith.constant 0 : index
      %32 = vector.load %arg15[%31, %c0_34, %c0_35] : memref<4x16x384xf32, #tpu.memory_space<vmem>>, vector<1x16x384xf32>
      %33 = vector.shape_cast %32 : vector<1x16x384xf32> to vector<16x384xf32>
      %34 = arith.truncf %30 : vector<16x128xf32> to vector<16x128xbf16>
      %cst_36 = arith.constant dense<0.000000e+00> : vector<16x384xf32>
      %35 = tpu.matmul %34, %26, %cst_36 {dimension_numbers = #tpu.dot_dimension_numbers<[1], [0], [0], [1], [0, 0, 1, 1], [], []>} : vector<16x128xbf16>, vector<128x384xbf16>, vector<16x384xf32> -> vector<16x384xf32>
      %36 = vector.extract_strided_slice %33 {offsets = [0, 0], sizes = [16, 128], strides = [1, 1]} : vector<16x384xf32> to vector<16x128xf32>
      %37 = vector.extract_strided_slice %35 {offsets = [0, 0], sizes = [16, 128], strides = [1, 1]} : vector<16x384xf32> to vector<16x128xf32>
      %38 = arith.addf %36, %37 : vector<16x128xf32>
      %39 = arith.negf %38 : vector<16x128xf32>
      %40 = math.exp %39 : vector<16x128xf32>
      %cst_37 = arith.constant 1.000000e+00 : f32
      %41 = vector.broadcast %cst_37 : f32 to vector<16x128xf32>
      %42 = arith.addf %41, %40 : vector<16x128xf32>
      %43 = arith.divf %41, %42 : vector<16x128xf32>
      %44 = vector.extract_strided_slice %33 {offsets = [0, 128], sizes = [16, 128], strides = [1, 1]} : vector<16x384xf32> to vector<16x128xf32>
      %45 = vector.extract_strided_slice %35 {offsets = [0, 128], sizes = [16, 128], strides = [1, 1]} : vector<16x384xf32> to vector<16x128xf32>
      %46 = arith.addf %44, %45 : vector<16x128xf32>
      %47 = arith.negf %46 : vector<16x128xf32>
      %48 = math.exp %47 : vector<16x128xf32>
      %cst_38 = arith.constant 1.000000e+00 : f32
      %49 = vector.broadcast %cst_38 : f32 to vector<16x128xf32>
      %50 = arith.addf %49, %48 : vector<16x128xf32>
      %51 = arith.divf %49, %50 : vector<16x128xf32>
      %52 = vector.extract_strided_slice %33 {offsets = [0, 256], sizes = [16, 128], strides = [1, 1]} : vector<16x384xf32> to vector<16x128xf32>
      %53 = vector.extract_strided_slice %35 {offsets = [0, 256], sizes = [16, 128], strides = [1, 1]} : vector<16x384xf32> to vector<16x128xf32>
      %54 = arith.addf %53, %29 : vector<16x128xf32>
      %55 = arith.mulf %43, %54 : vector<16x128xf32>
      %56 = arith.addf %52, %55 : vector<16x128xf32>
      %57 = math.tanh %56 : vector<16x128xf32>
      %cst_39 = arith.constant 1.000000e+00 : f32
      %58 = vector.broadcast %cst_39 : f32 to vector<16x128xf32>
      %59 = arith.subf %58, %51 : vector<16x128xf32>
      %60 = arith.mulf %59, %57 : vector<16x128xf32>
      %61 = arith.mulf %51, %30 : vector<16x128xf32>
      %62 = arith.addf %60, %61 : vector<16x128xf32>
      %63 = arith.truncf %62 : vector<16x128xf32> to vector<16x128xbf16>
      %64 = arith.index_cast %c0_i32_33 : i32 to index
      %c0_40 = arith.constant 0 : index
      %c0_41 = arith.constant 0 : index
      %65 = vector.load %arg14[%64, %c0_40, %c0_41] : memref<4x16x128xbf16, #tpu.memory_space<vmem>>, vector<1x16x128xbf16>
      %66 = vector.shape_cast %65 : vector<1x16x128xbf16> to vector<16x128xbf16>
      %67 = vector.shape_cast %63 : vector<16x128xbf16> to vector<1x16x128xbf16>
      tpu.vector_store %arg14[%64, %c0_40, %c0_41], %67 {strides = array<i32>} : memref<4x16x128xbf16, #tpu.memory_space<vmem>>, vector<1x16x128xbf16>,
      %c1_i32 = arith.constant 1 : i32
      %68 = arith.index_cast %c1_i32 : i32 to index
      %c0_42 = arith.constant 0 : index
      %c0_43 = arith.constant 0 : index
      %69 = vector.load %arg15[%68, %c0_42, %c0_43] : memref<4x16x384xf32, #tpu.memory_space<vmem>>, vector<1x16x384xf32>
      %70 = vector.shape_cast %69 : vector<1x16x384xf32> to vector<16x384xf32>
      %71 = arith.truncf %62 : vector<16x128xf32> to vector<16x128xbf16>
      %cst_44 = arith.constant dense<0.000000e+00> : vector<16x384xf32>
      %72 = tpu.matmul %71, %26, %cst_44 {dimension_numbers = #tpu.dot_dimension_numbers<[1], [0], [0], [1], [0, 0, 1, 1], [], []>} : vector<16x128xbf16>, vector<128x384xbf16>, vector<16x384xf32> -> vector<16x384xf32>
      %73 = vector.extract_strided_slice %70 {offsets = [0, 0], sizes = [16, 128], strides = [1, 1]} : vector<16x384xf32> to vector<16x128xf32>
      %74 = vector.extract_strided_slice %72 {offsets = [0, 0], sizes = [16, 128], strides = [1, 1]} : vector<16x384xf32> to vector<16x128xf32>
      %75 = arith.addf %73, %74 : vector<16x128xf32>
      %76 = arith.negf %75 : vector<16x128xf32>
      %77 = math.exp %76 : vector<16x128xf32>
      %cst_45 = arith.constant 1.000000e+00 : f32
      %78 = vector.broadcast %cst_45 : f32 to vector<16x128xf32>
      %79 = arith.addf %78, %77 : vector<16x128xf32>
      %80 = arith.divf %78, %79 : vector<16x128xf32>
      %81 = vector.extract_strided_slice %70 {offsets = [0, 128], sizes = [16, 128], strides = [1, 1]} : vector<16x384xf32> to vector<16x128xf32>
      %82 = vector.extract_strided_slice %72 {offsets = [0, 128], sizes = [16, 128], strides = [1, 1]} : vector<16x384xf32> to vector<16x128xf32>
      %83 = arith.addf %81, %82 : vector<16x128xf32>
      %84 = arith.negf %83 : vector<16x128xf32>
      %85 = math.exp %84 : vector<16x128xf32>
      %cst_46 = arith.constant 1.000000e+00 : f32
      %86 = vector.broadcast %cst_46 : f32 to vector<16x128xf32>
      %87 = arith.addf %86, %85 : vector<16x128xf32>
      %88 = arith.divf %86, %87 : vector<16x128xf32>
      %89 = vector.extract_strided_slice %70 {offsets = [0, 256], sizes = [16, 128], strides = [1, 1]} : vector<16x384xf32> to vector<16x128xf32>
      %90 = vector.extract_strided_slice %72 {offsets = [0, 256], sizes = [16, 128], strides = [1, 1]} : vector<16x384xf32> to vector<16x128xf32>
      %91 = arith.addf %90, %29 : vector<16x128xf32>
      %92 = arith.mulf %80, %91 : vector<16x128xf32>
      %93 = arith.addf %89, %92 : vector<16x128xf32>
      %94 = math.tanh %93 : vector<16x128xf32>
      %cst_47 = arith.constant 1.000000e+00 : f32
      %95 = vector.broadcast %cst_47 : f32 to vector<16x128xf32>
      %96 = arith.subf %95, %88 : vector<16x128xf32>
      %97 = arith.mulf %96, %94 : vector<16x128xf32>
      %98 = arith.mulf %88, %62 : vector<16x128xf32>
      %99 = arith.addf %97, %98 : vector<16x128xf32>
      %100 = arith.truncf %99 : vector<16x128xf32> to vector<16x128xbf16>
      %101 = arith.index_cast %c1_i32 : i32 to index
      %c0_48 = arith.constant 0 : index
      %c0_49 = arith.constant 0 : index
      %102 = vector.load %arg14[%101, %c0_48, %c0_49] : memref<4x16x128xbf16, #tpu.memory_space<vmem>>, vector<1x16x128xbf16>
      %103 = vector.shape_cast %102 : vector<1x16x128xbf16> to vector<16x128xbf16>
      %104 = vector.shape_cast %100 : vector<16x128xbf16> to vector<1x16x128xbf16>
      tpu.vector_store %arg14[%101, %c0_48, %c0_49], %104 {strides = array<i32>} : memref<4x16x128xbf16, #tpu.memory_space<vmem>>, vector<1x16x128xbf16>,
      %c2_i32 = arith.constant 2 : i32
      %105 = arith.index_cast %c2_i32 : i32 to index
      %c0_50 = arith.constant 0 : index
      %c0_51 = arith.constant 0 : index
      %106 = vector.load %arg15[%105, %c0_50, %c0_51] : memref<4x16x384xf32, #tpu.memory_space<vmem>>, vector<1x16x384xf32>
      %107 = vector.shape_cast %106 : vector<1x16x384xf32> to vector<16x384xf32>
      %108 = arith.truncf %99 : vector<16x128xf32> to vector<16x128xbf16>
      %cst_52 = arith.constant dense<0.000000e+00> : vector<16x384xf32>
      %109 = tpu.matmul %108, %26, %cst_52 {dimension_numbers = #tpu.dot_dimension_numbers<[1], [0], [0], [1], [0, 0, 1, 1], [], []>} : vector<16x128xbf16>, vector<128x384xbf16>, vector<16x384xf32> -> vector<16x384xf32>
      %110 = vector.extract_strided_slice %107 {offsets = [0, 0], sizes = [16, 128], strides = [1, 1]} : vector<16x384xf32> to vector<16x128xf32>
      %111 = vector.extract_strided_slice %109 {offsets = [0, 0], sizes = [16, 128], strides = [1, 1]} : vector<16x384xf32> to vector<16x128xf32>
      %112 = arith.addf %110, %111 : vector<16x128xf32>
      %113 = arith.negf %112 : vector<16x128xf32>
      %114 = math.exp %113 : vector<16x128xf32>
      %cst_53 = arith.constant 1.000000e+00 : f32
      %115 = vector.broadcast %cst_53 : f32 to vector<16x128xf32>
      %116 = arith.addf %115, %114 : vector<16x128xf32>
      %117 = arith.divf %115, %116 : vector<16x128xf32>
      %118 = vector.extract_strided_slice %107 {offsets = [0, 128], sizes = [16, 128], strides = [1, 1]} : vector<16x384xf32> to vector<16x128xf32>
      %119 = vector.extract_strided_slice %109 {offsets = [0, 128], sizes = [16, 128], strides = [1, 1]} : vector<16x384xf32> to vector<16x128xf32>
      %120 = arith.addf %118, %119 : vector<16x128xf32>
      %121 = arith.negf %120 : vector<16x128xf32>
      %122 = math.exp %121 : vector<16x128xf32>
      %cst_54 = arith.constant 1.000000e+00 : f32
      %123 = vector.broadcast %cst_54 : f32 to vector<16x128xf32>
      %124 = arith.addf %123, %122 : vector<16x128xf32>
      %125 = arith.divf %123, %124 : vector<16x128xf32>
      %126 = vector.extract_strided_slice %107 {offsets = [0, 256], sizes = [16, 128], strides = [1, 1]} : vector<16x384xf32> to vector<16x128xf32>
      %127 = vector.extract_strided_slice %109 {offsets = [0, 256], sizes = [16, 128], strides = [1, 1]} : vector<16x384xf32> to vector<16x128xf32>
      %128 = arith.addf %127, %29 : vector<16x128xf32>
      %129 = arith.mulf %117, %128 : vector<16x128xf32>
      %130 = arith.addf %126, %129 : vector<16x128xf32>
      %131 = math.tanh %130 : vector<16x128xf32>
      %cst_55 = arith.constant 1.000000e+00 : f32
      %132 = vector.broadcast %cst_55 : f32 to vector<16x128xf32>
      %133 = arith.subf %132, %125 : vector<16x128xf32>
      %134 = arith.mulf %133, %131 : vector<16x128xf32>
      %135 = arith.mulf %125, %99 : vector<16x128xf32>
      %136 = arith.addf %134, %135 : vector<16x128xf32>
      %137 = arith.truncf %136 : vector<16x128xf32> to vector<16x128xbf16>
      %138 = arith.index_cast %c2_i32 : i32 to index
      %c0_56 = arith.constant 0 : index
      %c0_57 = arith.constant 0 : index
      %139 = vector.load %arg14[%138, %c0_56, %c0_57] : memref<4x16x128xbf16, #tpu.memory_space<vmem>>, vector<1x16x128xbf16>
      %140 = vector.shape_cast %139 : vector<1x16x128xbf16> to vector<16x128xbf16>
      %141 = vector.shape_cast %137 : vector<16x128xbf16> to vector<1x16x128xbf16>
      tpu.vector_store %arg14[%138, %c0_56, %c0_57], %141 {strides = array<i32>} : memref<4x16x128xbf16, #tpu.memory_space<vmem>>, vector<1x16x128xbf16>,
      %c3_i32 = arith.constant 3 : i32
      %142 = arith.index_cast %c3_i32 : i32 to index
      %c0_58 = arith.constant 0 : index
      %c0_59 = arith.constant 0 : index
      %143 = vector.load %arg15[%142, %c0_58, %c0_59] : memref<4x16x384xf32, #tpu.memory_space<vmem>>, vector<1x16x384xf32>
      %144 = vector.shape_cast %143 : vector<1x16x384xf32> to vector<16x384xf32>
      %145 = arith.truncf %136 : vector<16x128xf32> to vector<16x128xbf16>
      %cst_60 = arith.constant dense<0.000000e+00> : vector<16x384xf32>
      %146 = tpu.matmul %145, %26, %cst_60 {dimension_numbers = #tpu.dot_dimension_numbers<[1], [0], [0], [1], [0, 0, 1, 1], [], []>} : vector<16x128xbf16>, vector<128x384xbf16>, vector<16x384xf32> -> vector<16x384xf32>
      %147 = vector.extract_strided_slice %144 {offsets = [0, 0], sizes = [16, 128], strides = [1, 1]} : vector<16x384xf32> to vector<16x128xf32>
      %148 = vector.extract_strided_slice %146 {offsets = [0, 0], sizes = [16, 128], strides = [1, 1]} : vector<16x384xf32> to vector<16x128xf32>
      %149 = arith.addf %147, %148 : vector<16x128xf32>
      %150 = arith.negf %149 : vector<16x128xf32>
      %151 = math.exp %150 : vector<16x128xf32>
      %cst_61 = arith.constant 1.000000e+00 : f32
      %152 = vector.broadcast %cst_61 : f32 to vector<16x128xf32>
      %153 = arith.addf %152, %151 : vector<16x128xf32>
      %154 = arith.divf %152, %153 : vector<16x128xf32>
      %155 = vector.extract_strided_slice %144 {offsets = [0, 128], sizes = [16, 128], strides = [1, 1]} : vector<16x384xf32> to vector<16x128xf32>
      %156 = vector.extract_strided_slice %146 {offsets = [0, 128], sizes = [16, 128], strides = [1, 1]} : vector<16x384xf32> to vector<16x128xf32>
      %157 = arith.addf %155, %156 : vector<16x128xf32>
      %158 = arith.negf %157 : vector<16x128xf32>
      %159 = math.exp %158 : vector<16x128xf32>
      %cst_62 = arith.constant 1.000000e+00 : f32
      %160 = vector.broadcast %cst_62 : f32 to vector<16x128xf32>
      %161 = arith.addf %160, %159 : vector<16x128xf32>
      %162 = arith.divf %160, %161 : vector<16x128xf32>
      %163 = vector.extract_strided_slice %144 {offsets = [0, 256], sizes = [16, 128], strides = [1, 1]} : vector<16x384xf32> to vector<16x128xf32>
      %164 = vector.extract_strided_slice %146 {offsets = [0, 256], sizes = [16, 128], strides = [1, 1]} : vector<16x384xf32> to vector<16x128xf32>
      %165 = arith.addf %164, %29 : vector<16x128xf32>
      %166 = arith.mulf %154, %165 : vector<16x128xf32>
      %167 = arith.addf %163, %166 : vector<16x128xf32>
      %168 = math.tanh %167 : vector<16x128xf32>
      %cst_63 = arith.constant 1.000000e+00 : f32
      %169 = vector.broadcast %cst_63 : f32 to vector<16x128xf32>
      %170 = arith.subf %169, %162 : vector<16x128xf32>
      %171 = arith.mulf %170, %168 : vector<16x128xf32>
      %172 = arith.mulf %162, %136 : vector<16x128xf32>
      %173 = arith.addf %171, %172 : vector<16x128xf32>
      %174 = arith.truncf %173 : vector<16x128xf32> to vector<16x128xbf16>
      %175 = arith.index_cast %c3_i32 : i32 to index
      %c0_64 = arith.constant 0 : index
      %c0_65 = arith.constant 0 : index
      %176 = vector.load %arg14[%175, %c0_64, %c0_65] : memref<4x16x128xbf16, #tpu.memory_space<vmem>>, vector<1x16x128xbf16>
      %177 = vector.shape_cast %176 : vector<1x16x128xbf16> to vector<16x128xbf16>
      %178 = vector.shape_cast %174 : vector<16x128xbf16> to vector<1x16x128xbf16>
      tpu.vector_store %arg14[%175, %c0_64, %c0_65], %178 {strides = array<i32>} : memref<4x16x128xbf16, #tpu.memory_space<vmem>>, vector<1x16x128xbf16>,
      %c4_i32 = arith.constant 4 : i32
      %c0_66 = arith.constant 0 : index
      %c0_67 = arith.constant 0 : index
      %179 = vector.load %arg13[%c0_66, %c0_67] : memref<16x128xf32, #tpu.memory_space<vmem>>, vector<16x128xf32>
      tpu.vector_store %arg13[%c0_66, %c0_67], %173 {strides = array<i32>} : memref<16x128xf32, #tpu.memory_space<vmem>>, vector<16x128xf32>,
    } else {
    }
    %c0 = arith.constant 0 : index
    %c0_1 = arith.constant 0 : index
    %c0_2 = arith.constant 0 : index
    %3 = vector.load %arg14[%c0, %c0_1, %c0_2] : memref<4x16x128xbf16, #tpu.memory_space<vmem>>, vector<4x16x128xbf16>
    %4 = vector.shape_cast %3 : vector<4x16x128xbf16> to vector<64x128xbf16>
    %c0_3 = arith.constant 0 : index
    %c0_4 = arith.constant 0 : index
    %5 = vector.load %arg9[%c0_3, %c0_4] : memref<128x128xbf16, #tpu.memory_space<vmem>>, vector<128x128xbf16>
    %cst = arith.constant dense<0.000000e+00> : vector<64x128xf32>
    %6 = tpu.matmul %4, %5, %cst {dimension_numbers = #tpu.dot_dimension_numbers<[1], [0], [0], [1], [0, 0, 1, 1], [], []>} : vector<64x128xbf16>, vector<128x128xbf16>, vector<64x128xf32> -> vector<64x128xf32>
    %c0_5 = arith.constant 0 : index
    %c0_6 = arith.constant 0 : index
    %7 = vector.load %arg10[%c0_5, %c0_6] : memref<1x128xf32, #tpu.memory_space<vmem>>, vector<1x128xf32>
    %8 = vector.broadcast %7 : vector<1x128xf32> to vector<64x128xf32>
    %9 = arith.addf %6, %8 : vector<64x128xf32>
    %10 = vector.shape_cast %9 : vector<64x128xf32> to vector<4x16x128xf32>
    %c0_7 = arith.constant 0 : index
    %c0_8 = arith.constant 0 : index
    %c0_9 = arith.constant 0 : index
    %11 = vector.load %arg11[%c0_7, %c0_8, %c0_9] : memref<4x16x128xf32, #tpu.memory_space<vmem>>, vector<4x16x128xf32>
    tpu.vector_store %arg11[%c0_7, %c0_8, %c0_9], %10 {strides = array<i32>} : memref<4x16x128xf32, #tpu.memory_space<vmem>>, vector<4x16x128xf32>,
    %c0_10 = arith.constant 0 : index
    %c0_11 = arith.constant 0 : index
    %12 = vector.load %arg13[%c0_10, %c0_11] : memref<16x128xf32, #tpu.memory_space<vmem>>, vector<16x128xf32>
    %c0_12 = arith.constant 0 : index
    %c0_13 = arith.constant 0 : index
    %13 = vector.load %arg12[%c0_12, %c0_13] : memref<16x128xf32, #tpu.memory_space<vmem>>, vector<16x128xf32>
    tpu.vector_store %arg12[%c0_12, %c0_13], %12 {strides = array<i32>} : memref<16x128xf32, #tpu.memory_space<vmem>>, vector<16x128xf32>,
    return
  }
  func.func @transform_0(%arg0: i32, %arg1: i32, %arg2: i32) -> (i32, i32, i32) {
    %c0_i32 = arith.constant 0 : i32
    %c0_i32_0 = arith.constant 0 : i32
    return %arg1, %arg0, %c0_i32 : i32, i32, i32
  }
  func.func @transform_1(%arg0: i32, %arg1: i32, %arg2: i32) -> (i32, i32) {
    %c0_i32 = arith.constant 0 : i32
    %c0_i32_0 = arith.constant 0 : i32
    return %arg0, %c0_i32 : i32, i32
  }
  func.func @transform_2(%arg0: i32, %arg1: i32, %arg2: i32) -> (i32, i32) {
    %c0_i32 = arith.constant 0 : i32
    %c0_i32_0 = arith.constant 0 : i32
    %c0_i32_1 = arith.constant 0 : i32
    return %c0_i32, %c0_i32_0 : i32, i32
  }
  func.func @transform_3(%arg0: i32, %arg1: i32, %arg2: i32) -> (i32, i32) {
    %c0_i32 = arith.constant 0 : i32
    %c0_i32_0 = arith.constant 0 : i32
    %c0_i32_1 = arith.constant 0 : i32
    return %c0_i32, %c0_i32_0 : i32, i32
  }
  func.func @transform_4(%arg0: i32, %arg1: i32, %arg2: i32) -> (i32, i32) {
    %c0_i32 = arith.constant 0 : i32
    %c0_i32_0 = arith.constant 0 : i32
    %c0_i32_1 = arith.constant 0 : i32
    return %c0_i32, %c0_i32_0 : i32, i32
  }
  func.func @transform_5(%arg0: i32, %arg1: i32, %arg2: i32) -> (i32, i32) {
    %c0_i32 = arith.constant 0 : i32
    %c0_i32_0 = arith.constant 0 : i32
    %c0_i32_1 = arith.constant 0 : i32
    return %c0_i32, %c0_i32_0 : i32, i32
  }
  func.func @transform_6(%arg0: i32, %arg1: i32, %arg2: i32) -> (i32, i32) {
    %c0_i32 = arith.constant 0 : i32
    %c0_i32_0 = arith.constant 0 : i32
    return %c0_i32, %arg2 : i32, i32
  }
  func.func @transform_7(%arg0: i32, %arg1: i32, %arg2: i32) -> (i32, i32) {
    %c0_i32 = arith.constant 0 : i32
    %c0_i32_0 = arith.constant 0 : i32
    return %c0_i32, %arg2 : i32, i32
  }
  func.func @transform_8(%arg0: i32, %arg1: i32, %arg2: i32) -> (i32, i32, i32) {
    %c0_i32 = arith.constant 0 : i32
    return %arg1, %arg0, %arg2 : i32, i32, i32
  }
  func.func @transform_9(%arg0: i32, %arg1: i32, %arg2: i32) -> (i32, i32) {
    %c0_i32 = arith.constant 0 : i32
    %c0_i32_0 = arith.constant 0 : i32
    return %arg0, %c0_i32 : i32, i32
  }
}

</mosaic_0001>

<bundles_post_ra>
// kernel: tpu_custom_call.1
= control target key start
LH: loop header
LB: loop body
LE: loop exit
PB: predicated region body
PF: predicated region fallthrough
CT: control target
= control target key end

     0   :  { %s3799_s0 = inlined_call_operand.hbm [shape: bf16[8,16,128], index: 0, kind: input, shape index: {}]   ;;  %s3800_s1 = inlined_call_operand.hbm [shape: f32[16,128], index: 1, kind: input, shape index: {}]   ;;  %s3801_s2 = inlined_call_operand.hbm [shape: bf16[128,384], index: 2, kind: input, shape index: {}]   ;;  %s3802_s3 = inlined_call_operand.hbm [shape: bf16[128,384], index: 3, kind: input, shape index: {}]   ;;  %s3803_s4 = inlined_call_operand.vmem [shape: f32[1,384], index: 4, kind: input, shape index: {}]   ;;  %s3804_s5 = inlined_call_operand.vmem [shape: f32[1,128], index: 5, kind: input, shape index: {}]   ;;  %s3805_s6 = inlined_call_operand.hbm [shape: bf16[128,256], index: 6, kind: input, shape index: {}]   ;;  %s3806_s7 = inlined_call_operand.vmem [shape: f32[1,256], index: 7, kind: input, shape index: {}]   ;;  %s3807_s8 = inlined_call_operand.hbm [shape: f32[8,16,256], index: 8, kind: output, shape index: {0}]   ;;  %s3808_s9 = inlined_call_operand.hbm [shape: f32[16,128], index: 9, kind: output, shape index: {1}]  }
   0x1   :  { %3842 = sst [smem:[#allocation38_spill]] %s3799_s0 }
   0x2   :  { %3843 = sst [smem:[#allocation39_spill]] %s3800_s1 }
   0x3   :  { %3844 = sst [smem:[#allocation40_spill]] %s3803_s4 }
   0x4   :  { %3845 = sst [smem:[#allocation41_spill]] %s3804_s5 }
   0x5   :  { %3846 = sst [smem:[#allocation42_spill]] %s3806_s7 }
   0x6   :  { %3847 = sst [smem:[#allocation43_spill]] %s3807_s8 }
   0x7   :  { %3848 = sst [smem:[#allocation44_spill]] %s3808_s9 }
   0x8   :  { %15 = vsyncpa [#allocation6], 0 }
   0x9   :  { %17 = vsyncpa [#allocation6 + $0x1], 0 }
   0xa   :  { %18 = vsyncpa [#allocation9], 0 }
   0xb   :  { %19 = vsyncpa [#allocation12], 0 }
   0xc   :  { %20 = vsyncpa [#allocation7], 0 }
   0xd   :  { %22 = vsyncpa [#allocation7 + $0x1], 0 }
   0xe   :  { %23 = vsyncpa [#allocation16], 0  ;;  %s3038_s30 = smov 0   ;;  %s3040_s10 = smov 0  }
   0xf   :  { %s3042_s11 = smov 0   ;;  %s3044_s12 = smov 0  }
  0x10   :  { %s3046_s13 = smov 0   ;;  %s3048_s14 = smov 0  }
  0x11   :  { %s3050_s15 = smov 0   ;;  %s3052_s16 = smov 0  }
  0x12   :  { %s3054_s17 = smov 0   ;;  %s3056_s18 = smov 0  }
  0x13   :  { %s3058_s19 = smov 0   ;;  %s3060_s20 = smov 0  }
  0x14   :  { %s3062_s21 = smov 0   ;;  %s3064_s22 = smov 0  }
  0x15 LB: > { %3849 = sst [smem:[#allocation23_spill]] %s2915_s30  ;;  %s3105_s23 = sadd.s32 4294967295, %s2967_s22   ;;  %s2967_s22 = sphi %s3064_s22, %s29_s22   ;;  %s2963_s21 = sphi %s3062_s21, %s3926_s21   ;;  %s2959_s20 = sphi %s3060_s20, %s3935_s20   ;;  %s2955_s19 = sphi %s3058_s19, %s3924_s19   ;;  %s2951_s18 = sphi %s3056_s18, %s3934_s18   ;;  %s2947_s17 = sphi %s3054_s17, %s3923_s17   ;;  %s2943_s16 = sphi %s3052_s16, %s3933_s16   ;;  %s2939_s15 = sphi %s3050_s15, %s3932_s15   ;;  %s2935_s14 = sphi %s3048_s14, %s3931_s14   ;;  %s2931_s13 = sphi %s3046_s13, %s3930_s13   ;;  %s2927_s12 = sphi %s3044_s12, %s3920_s12   ;;  %s2923_s11 = sphi %s3042_s11, %s3929_s11   ;;  %s2919_s10 = sphi %s3040_s10, %s3928_s10   ;;  %s2915_s30 = sphi %s3038_s30, %s3919_s30  }
  0x16   : > { %3850 = sst [smem:[#allocation24_spill]] %s2919_s10  ;;  %s1952_s24 = sadd.s32 4294967294, %s2967_s22  }
  0x17   : > { %3851 = sst [smem:[#allocation25_spill]] %s2931_s13  ;;  %p70_p0 = scmp.ne.s32.totalorder %s2943_s16, %s2939_s15 }
  0x18   : > { %3852 = sst [smem:[#allocation26_spill]] %s2947_s17  ;;  %p3816_p1 = scmp.eq.s32.totalorder %s3105_s23, 0 }
  0x19   : > { %3853 = sst [smem:[#allocation27_spill]] %s2951_s18  ;;  %p206_p3 = scmp.ne.s32.totalorder %s2931_s13, %s2927_s12 }
  0x1a   : > { %3854 = sst [smem:[#allocation28_spill]] %s2955_s19  ;;  %p3115_p4 = por %p3816_p1, %p70_p0 }
  0x1b   : > { %3855 = sst [smem:[#allocation29_spill]] %s2963_s21  ;;  %p259_p5 = scmp.ne.s32.totalorder %s2923_s11, %s2919_s10 }
  0x1c   : > { %s3856_s25 = scalar_select %p3115_p4, 1, 0 }
  0x1d   : > { %p3123_p6 = por %p206_p3, %p3816_p1  ;;  %p3815_p7 = scmp.eq.s32.totalorder %s3105_s23, 3 }
  0x1e   : > { %3857 = sst [smem:[#allocation30_spill]] %s3856_s25  ;;  %p265_p8 = scmp.ne.s32.totalorder %s2919_s10, %s2915_s30 }
  0x1f   : > { %s3858_s26 = scalar_select %p3123_p6, 1, 0 }
  0x20   : > { %p266_p9 = scmp.eq.s32.totalorder %s1952_s24, 3  ;;  %p3132_p10 = por %p3815_p7, %p259_p5 }
  0x21   : > { %3859 = sst [smem:[#allocation31_spill]] %s3858_s26  ;;  %p1953_p11 = scmp.ge.s32.totalorder %s2967_s22, 1 }
  0x22   : > { %s3860_s27 = scalar_select %p3132_p10, 1, 0 }
  0x23   : > { %p3137_p12 = por %p266_p9, %p265_p8  ;;  %p299_p13 = scmp.lt.s32.totalorder %s2967_s22, 5 }
  0x24   : > { %3861 = sst [smem:[#allocation32_spill]] %s3860_s27  ;;  %s2969_s12 = smov [#allocation8]  }
  0x25   : > { %s3862_s28 = scalar_select %p3137_p12, 1, 0 }
  0x26   : > { %p3142_p0 = pnand %p1953_p11, %p299_p13  ;;  %s314_s15 = sshll.u32 %s2969_s12, 4  ;;  %s315_s15 = int_to_ptr.vmem [resolvable:$true] %s314_s15 }
  0x27   : > { %3863 = sst [smem:[#allocation33_spill]] %s3862_s28  ;;  %s3866_s1 = sld [smem:[#allocation39_spill]] }
  0x28   : > { %s3864_s29 = scalar_select %p3142_p0, 1, 0 }
  0x29   : > { %p2320_p3 = pneg %p3142_p0 }
  0x2b   : > { %p3150_p5 = pnand %p2320_p3, %p3816_p1 }
  0x2d   : > { %s3865_s24 = scalar_select %p3150_p5, 1, 0 }
  0x2e   : > { %s2635_s28 = scalar_lea.hbm %s3866_s1, 256  ;;  %p3162_p9 = pneg %p3150_p5 }
  0x2f   : > { %p2636_p8 = scmp.ne.s32.totalorder %s3866_s1, %s2635_s28  ;;  %p2642_p3 = scmp.lt.u32.totalorder %s2635_s28, %s3866_s1 }
  0x30   : > { %s3867_s12 = scalar_select %p3162_p9, 1, 0 }
  0x31   : > { %p2638_p11 = pnand %p3162_p9, %p2636_p8 }
  0x33   : > { %p2639_p13 = pneg %p2638_p11 }
  0x35   : > { %p2644_p7 = pnand %p2642_p3, %p2639_p13 }
  0x37   : > { %2647 = shalt.err (!%p2644_p7)
}
  0x38   : > { %s2648_s8 = scalar_lea.vmem %s315_s15, 256  ;;  %p2656_p10 = scmp.lt.s32.totalorder %s315_s15, %s315_s15 }
  0x39   : > { %p2649_p1 = scmp.ne.s32.totalorder %s315_s15, %s2648_s8  ;;  %p2657_p6 = scmp.lt.s32.totalorder %s2648_s8, %s2648_s8 }
  0x3b   : > { %p2651_p2 = pnand %p2649_p1, %p3162_p9  ;;  %p2658_p4 = por %p2657_p6, %p2656_p10 }
  0x3d   : > { %p2652_p12 = pneg %p2651_p2 }
  0x3f   : > { %p2659_p0 = pnand %p2658_p4, %p2652_p12 }
  0x41   : > { %2662 = shalt.err (!%p2659_p0)
}
  0x42   : > { %s3821_s9 = smov 128   ;;  %s2971_s4 = smov 8  }
  0x43   : > { %2323 = dma.hbm_to_vmem [thread:$0]  (!%p3150_p5), %s3866_s1, 256, %s315_s15, [#allocation9], %s3821_s9, %s3821_s9, %s2971_s4  }
  0x44   : > { %s41_s27 = sadd.s32 1, %s2959_s20  ;;  %s44_s28 = sadd.s32 1, %s2963_s21 }
  0x45   : > { %p42_p1 = scmp.ge.s32.totalorder %s41_s27, 2  ;;  %s57_s8 = sadd.s32 1, %s2947_s17 }
  0x46   : > { %p64_p2 = scmp.ne.s32.totalorder %s2947_s17, %s2943_s16  ;;  %p65_p4 = scmp.eq.s32.totalorder %s2967_s22, 0 }
  0x47   : > { %s3937_s27 = smov (%p42_p1, %s41_s27), 0  ;;  %s3939_s28 = smov (!%p42_p1, %s44_s28), %s2963_s21 }
  0x48   : > { %3868 = sst [smem:[#allocation34_spill]] %s3937_s27  ;;  %s190_s5 = ssub.s32 %s2959_s20, %s3937_s27 }
  0x49   : > { %p46_p6 = scmp.ge.s32.totalorder %s3939_s28, 2  ;;  %p191_p7 = scmp.eq.s32.totalorder %s190_s5, 0 }
  0x4a   : > { %p3191_p10 = por %p65_p4, %p64_p2  ;;  %s193_s4 = sadd.s32 1, %s2935_s14 }
  0x4b   : > { %s3941_s28 = smov (%p46_p6, %s3939_s28), 0  ;;  %p3872_p12 = scmp.ne.s32.totalorder %s2935_s14, %s2931_s13 }
  0x4c   : > { %3870 = sst [smem:[#allocation35_spill]] %s3941_s28  ;;  %s52_s9 = ssub.s32 %s2963_s21, %s3941_s28 }
  0x4d   : > { %s3199_s30 = scalar_select %p191_p7, %s2935_s14, %s193_s4  }
  0x4e   : > { %p3206_p0 = por %p3872_p12, %p65_p4  ;;  %p55_p8 = scmp.eq.s32.totalorder %s52_s9, 0 }
  0x4f   : > { %3871 = sst [smem:[#allocation36_spill]] %s3199_s30  ;;  %s246_s27 = sor.u32 %s190_s5, %s52_s9 }
  0x50   : > { %p247_p11 = scmp.eq.s32.totalorder %s246_s27, 0  ;;  %s249_s19 = sadd.s32 1, %s2923_s11 }
  0x51   : > { %s3212_s7 = scalar_select %p55_p8, %s2947_s17, %s57_s8  }
  0x52   : > { %s3215_s18 = scalar_select %p247_p11, %s2923_s11, %s249_s19  }
  0x53   : > { %3874 = sst [smem:[#allocation37_spill]] %s3212_s7  ;;  %p3832_p13 = scmp.lt.s32.totalorder %s2967_s22, 4 }
  0x54   : > { %s360_s10 = sand.u32 1, %s2967_s22   ;;  %s362_s4 = sand.u32 1, %s2947_s17  }
  0x55   : > { %s1958_s30 = sshll.u32 %s362_s4, 5  ;;  %s2060_s28 = sshll.u32 %s2963_s21, 9 }
  0x56   : > { %s3875_s0 = sld [smem:[#allocation38_spill]]  ;;  %s364_s9 = scalar_lea.vmem [#allocation5], %s1958_s30 }
  0x57   : > { %s374_s27 = sshll.u32 %s364_s9, 4  ;;  %p3230_p3 = pnand %p3832_p13, %p3191_p10  ;;  %s3234_s27 = int_to_ptr.vmem [resolvable:$true] %s374_s27 }
  0x58   : > { %s3236_s8 = scalar_lea.sflag [#allocation6], %s360_s10 }
  0x59   : > { %p2665_p2 = pneg %p3230_p3 }
  0x5c   : > { %s3224_s25 = scalar_lea.hbm %s3875_s0, %s2060_s28  ;;  %s2668_s5 = scalar_lea.hbm %s3875_s0, 1024 }
  0x5d   : > { %s2663_s13 = scalar_lea.hbm %s3224_s25, 512  ;;  %p2669_p7 = scmp.lt.u32.totalorder %s3224_s25, %s3875_s0 }
  0x5e   : > { %p2664_p1 = scmp.ne.s32.totalorder %s3224_s25, %s2663_s13  ;;  %p2670_p10 = scmp.lt.u32.totalorder %s2668_s5, %s2663_s13 }
  0x5f   : > { %p2672_p8 = scmp.lt.u32.totalorder %s2663_s13, %s3224_s25 }
  0x60   : > { %p2666_p4 = pnand %p2665_p2, %p2664_p1  ;;  %p2671_p12 = por %p2670_p10, %p2669_p7 }
  0x62   : > { %p2667_p6 = pneg %p2666_p4  ;;  %p2673_p11 = por %p2672_p8, %p2671_p12 }
  0x64   : > { %p2674_p13 = pnand %p2673_p11, %p2667_p6 }
  0x66   : > { %2677 = shalt.err (!%p2674_p13)
}
  0x67   : > { %s2678_s10 = scalar_lea.vmem %s3234_s27, 512  ;;  %s2972_s4 = smov [#allocation5]  }
  0x68   : > { %p2679_p1 = scmp.ne.s32.totalorder %s3234_s27, %s2678_s10  ;;  %s2683_s9 = sshll.u32 %s2972_s4, 4  ;;  %s2684_s9 = int_to_ptr.vmem [resolvable:$false] %s2683_s9 }
  0x69   : > { %s2685_s26 = scalar_lea.vmem %s2684_s9, 1024  ;;  %p2686_p9 = scmp.lt.s32.totalorder %s3234_s27, %s2684_s9 }
  0x6a   : > { %p2681_p4 = pnand %p2679_p1, %p2665_p2  ;;  %p2687_p7 = scmp.lt.s32.totalorder %s2685_s26, %s2678_s10 }
  0x6c   : > { %p2682_p5 = pneg %p2681_p4  ;;  %p2688_p10 = por %p2687_p7, %p2686_p9 }
  0x6e   : > { %p2689_p12 = pnand %p2688_p10, %p2682_p5 }
  0x70   : > { %2692 = shalt.err (!%p2689_p12)
}
  0x71   : > { %s3837_s13 = smov 64   ;;  %s3838_s28 = smov 4  }
  0x72   : > { %2333 = dma.hbm_to_vmem [thread:$0]  (!%p3230_p3), %s3224_s25, 512, %s3234_s27, %s3236_s8, %s3837_s13, %s3837_s13, %s3838_s28  }
  0x73   : > { %p3877_p13 = scmp.lt.s32.totalorder %s2967_s22, 4  ;;  %s2975_s15 = smov [#allocation10]  }
  0x74   : > { %s327_s30 = sshll.u32 %s2975_s15, 4  ;;  %s2693_s9 = scalar_lea.hbm %s3801_s2, 3072  ;;  %s328_s30 = int_to_ptr.vmem [resolvable:$true] %s327_s30 }
  0x75   : > { %p3271_p2 = pnand %p3877_p13, %p3206_p0  ;;  %p2694_p5 = scmp.ne.s32.totalorder %s3801_s2, %s2693_s9 }
  0x76   : > { %p3879_p9 = scmp.ne.s32.totalorder %s3867_s12, 0  ;;  %p2700_p0 = scmp.lt.u32.totalorder %s2693_s9, %s3801_s2 }
  0x77   : > { %s3878_s5 = scalar_select %p3271_p2, 1, 0 }
  0x78   : > { %p2696_p6 = pnand %p2694_p5, %p3879_p9 }
  0x7a   : > { %p2697_p3 = pneg %p2696_p6 }
  0x7c   : > { %p2702_p8 = pnand %p2700_p0, %p2697_p3 }
  0x7e   : > { %2705 = shalt.err (!%p2702_p8)
}
  0x7f   : > { %s2706_s27 = scalar_lea.vmem %s328_s30, 3072  ;;  %p2714_p7 = scmp.lt.s32.totalorder %s328_s30, %s328_s30 }
  0x80   : > { %p2707_p11 = scmp.ne.s32.totalorder %s328_s30, %s2706_s27  ;;  %p2715_p10 = scmp.lt.s32.totalorder %s2706_s27, %s2706_s27 }
  0x82   : > { %p2709_p1 = pnand %p2707_p11, %p3879_p9  ;;  %p2716_p12 = por %p2715_p10, %p2714_p7 }
  0x84   : > { %p2710_p4 = pneg %p2709_p1 }
  0x86   : > { %p2717_p13 = pnand %p2716_p12, %p2710_p4 }
  0x88   : > { %2720 = shalt.err (!%p2717_p13)
}
  0x89   : > { %s2976_s0 = smov 192   ;;  %s2977_s19 = smov 12  }
  0x8a   : > { %p3880_p5 = scmp.ne.s32.totalorder %s3865_s24, 0  ;;  %s2978_s4 = smov [#allocation11]  }
  0x8b   : > { %s340_s9 = sshll.u32 %s2978_s4, 4  ;;  %s386_s26 = sand.u32 1, %s2935_s14   ;;  %s341_s9 = int_to_ptr.vmem [resolvable:$true] %s340_s9 }
  0x8c   : > { %2326 = dma.hbm_to_vmem [thread:$0]  (!%p3880_p5), %s3801_s2, 3072, %s328_s30, [#allocation9], %s2976_s0, %s2976_s0, %s2977_s19  }
  0x8d   : > { %s1962_s1 = sshll.u32 %s386_s26, 6  ;;  %s2721_s13 = scalar_lea.hbm %s3802_s3, 3072 }
  0x8e   : > { %p2722_p6 = scmp.ne.s32.totalorder %s3802_s3, %s2721_s13  ;;  %p2728_p8 = scmp.lt.u32.totalorder %s2721_s13, %s3802_s3 }
  0x90   : > { %p2724_p3 = pnand %p2722_p6, %p3879_p9 }
  0x92   : > { %p2725_p0 = pneg %p2724_p3 }
  0x94   : > { %p2730_p11 = pnand %p2728_p8, %p2725_p0 }
  0x96   : > { %2733 = shalt.err (!%p2730_p11)
}
  0x97   : > { %s2734_s30 = scalar_lea.vmem %s341_s9, 3072  ;;  %p2742_p10 = scmp.lt.s32.totalorder %s341_s9, %s341_s9 }
  0x98   : > { %p2735_p1 = scmp.ne.s32.totalorder %s341_s9, %s2734_s30  ;;  %p2743_p12 = scmp.lt.s32.totalorder %s2734_s30, %s2734_s30 }
  0x9a   : > { %p2737_p4 = pnand %p2735_p1, %p3879_p9  ;;  %p2744_p13 = por %p2743_p12, %p2742_p10 }
  0x9c   : > { %p2738_p7 = pneg %p2737_p4 }
  0x9e   : > { %p2745_p2 = pnand %p2744_p13, %p2738_p7 }
  0xa0   : > { %2748 = shalt.err (!%p2745_p2)
}
  0xa1   : > { %2329 = dma.hbm_to_vmem [thread:$0]  (!%p3880_p5), %s3802_s3, 3072, %s341_s9, [#allocation12], %s2976_s0, %s2976_s0, %s2977_s19  }
  0xa2   : > { %s1963_s7 = sshll.u32 %s2959_s20, 6  ;;  %s388_s15 = scalar_lea.vmem [#allocation13], %s1962_s1 }
  0xa3   : > { %s3316_s12 = scalar_lea.hbm %s3805_s6, %s1963_s7  ;;  %s394_s10 = sshll.u32 %s388_s15, 4  ;;  %s3318_s10 = int_to_ptr.vmem [resolvable:$true] %s394_s10 }
  0xa4   : > { %s2749_s24 = scalar_lea.hbm %s3316_s12, 1024  ;;  %p3881_p9 = scmp.ne.s32.totalorder %s3878_s5, 0 }
  0xa5   : > { %p2750_p2 = scmp.ne.s32.totalorder %s3316_s12, %s2749_s24  ;;  %s2754_s4 = scalar_lea.hbm %s3805_s6, 2048 }
  0xa6   : > { %p2751_p6 = pneg %p3881_p9  ;;  %p2755_p0 = scmp.lt.u32.totalorder %s3316_s12, %s3805_s6 }
  0xa7   : > { %p2756_p8 = scmp.lt.u32.totalorder %s2754_s4, %s2749_s24  ;;  %p2758_p1 = scmp.lt.u32.totalorder %s2749_s24, %s3316_s12 }
  0xa8   : > { %p2752_p5 = pnand %p2751_p6, %p2750_p2 }
  0xa9   : > { %p2757_p11 = por %p2756_p8, %p2755_p0 }
  0xaa   : > { %p2753_p3 = pneg %p2752_p5 }
  0xab   : > { %p2759_p4 = por %p2758_p1, %p2757_p11 }
  0xad   : > { %p2760_p7 = pnand %p2759_p4, %p2753_p3 }
  0xaf   : > { %2763 = shalt.err (!%p2760_p7)
}
  0xb0   : > { %s2764_s1 = scalar_lea.vmem %s3318_s10, 1024  ;;  %s2979_s25 = smov [#allocation13]  }
  0xb1   : > { %p2765_p10 = scmp.ne.s32.totalorder %s3318_s10, %s2764_s1  ;;  %s2769_s27 = sshll.u32 %s2979_s25, 4  ;;  %s2770_s27 = int_to_ptr.vmem [resolvable:$false] %s2769_s27 }
  0xb2   : > { %s2771_s30 = scalar_lea.vmem %s2770_s27, 2048  ;;  %p2772_p2 = scmp.lt.s32.totalorder %s3318_s10, %s2770_s27 }
  0xb3   : > { %p2767_p12 = pnand %p2765_p10, %p2751_p6  ;;  %p2773_p5 = scmp.lt.s32.totalorder %s2771_s30, %s2764_s1 }
  0xb5   : > { %p2768_p13 = pneg %p2767_p12  ;;  %p2774_p0 = por %p2773_p5, %p2772_p2 }
  0xb7   : > { %p2775_p8 = pnand %p2774_p0, %p2768_p13 }
  0xb9   : > { %2778 = shalt.err (!%p2775_p8)
}
  0xba   : > { %s3882_s21 = smov 4   ;;  %s3883_s28 = smov 64  }
  0xbb   : > { %s3884_s7 = smov 128   ;;  %p3885_p6 = scmp.ne.s32.totalorder %s3864_s29, 0 }
  0xbc   : > { %2336 = dma.hbm_to_vmem [thread:$0]  (!%p3881_p9), %s3316_s12, 1024, %s3318_s10, %s3236_s8, %s3884_s7, %s3883_s28, %s3882_s21  }
  0xbd   : > { %412 = sbr.rel (%p3885_p6) target bundleno = 1626 (0x65a), region = 52  ;;  %s3886_s17 = sld [smem:[#allocation30_spill]] (!%p3885_p6) }
  0xbe   : > { %s414_s13 = sand.u32 (!%p3885_p6), 1, %s3105_s23   ;;  %s416_s15 = sand.u32 (!%p3885_p6), 1, %s2943_s16  }
  0xbf   : > { %s1965_s24 = sshll.u32 (!%p3885_p6), %s416_s15, 5  ;;  %s415_s0 = scalar_lea.sflag (!%p3885_p6), [#allocation6], %s414_s13 }
  0xc0   : > { %s3353_s19 = scalar_lea.vmem (!%p3885_p6), [#allocation5], %s1965_s24 }
  0xc3   : > { %p3887_p3 = scmp.ne.s32.totalorder (!%p3885_p6), %s3886_s17, 0 }
  0xc5   : > { %2890 = dma.done.wait (%p3887_p3), %s415_s0, 512  }
  0xc6   : > { %2892 = vsyncadd (%p3887_p3), %s415_s0, 4294966784  ;;  %p3888_p11 = scmp.eq.s32.totalorder %s3105_s23, 0 }
  0xc8   : > { %2894 = dma.done.wait (%p3888_p11), [#allocation9], 3328   ;;  %p3889_p9 = pmov %p3888_p11 }
  0xca   : > { %2896 = vsyncadd (%p3889_p9), [#allocation9], 4294963968  ;;  %p3890_p1 = pmov %p3889_p9 }
  0xcc   : > { %2898 = dma.done.wait (%p3890_p1), [#allocation12], 3072   ;;  %p3891_p4 = pmov %p3890_p1 }
  0xcd   : > { %s3892_s29 = sld [smem:[#allocation25_spill]]  ;;  %s3893_s8 = sld [smem:[#allocation31_spill]] }
  0xce   : > { %2900 = vsyncadd (%p3891_p4), [#allocation12], 4294964224 }
  0xd3   : > { %s437_s5 = sand.u32 1, %s3892_s29   ;;  %p3894_p7 = scmp.ne.s32.totalorder %s3893_s8, 0 }
  0xd4   : > { %s1969_s12 = sshll.u32 %s437_s5, 6 }
  0xd5   : > { %s3368_s10 = scalar_lea.vmem [#allocation13], %s1969_s12 }
  0xd6   : > { %2902 = dma.done.wait (%p3894_p7), %s415_s0, 1024  }
  0xd7   : > { %2904 = vsyncadd (%p3894_p7), %s415_s0, 4294966272  ;;  %s3895_s4 = sld [smem:[#allocation24_spill]]  ;;  %s3896_s9 = sld [smem:[#allocation27_spill]] }
  0xd8   : > { %s3897_s21 = sld [smem:[#allocation42_spill]] }
  0xdd   : > { %s477_s26 = sand.u32 1, %s3895_s4   ;;  %p485_p10 = scmp.lt.s32.totalorder %s3896_s9, 1 }
  0xde   : > { %s1970_s1 = sshll.u32 %s477_s26, 6  ;;  %p1971_p12 = scmp.ne.s32.totalorder %s3896_s9, 0 }
  0xdf   : > { %s3379_s25 = scalar_select %p485_p10, %s3896_s9, 1 }
  0xe0   : > { %s3385_s7 = scalar_lea.vmem [#allocation14], %s1970_s1  ;;  %495 = sbr.rel (%p1971_p12) target bundleno = 1358 (0x54e), region = 76 }
  0xe1   : > { %s487_s28 = scalar_lea.vmem %s3897_s21, %s3379_s25  ;;  %s3898_s17 = sld [smem:[#allocation28_spill]] (!%p1971_p12) }
  0xe7   : > { %p1972_p13 = scmp.ne.s32.totalorder %s3898_s17, 0 }
  0xe8   : > { %v500_v0 = vld [vmem:[#allocation8] sm:$0xff] (!%p1972_p13)  ;;  %v501_v1 = vld [vmem:[#allocation8 + $0x8] sm:$0xff] (!%p1972_p13) }
  0xe9   : > { %499 = sbr.rel (%p1972_p13) target bundleno = 240 (0xf0), region = 80  ;;  %502 = vst [vmem:[#allocation2] sm:$0xff] (!%p1972_p13), %v500_v0  ;;  %503 = vst [vmem:[#allocation2 + $0x8] sm:$0xff] (!%p1972_p13), %v501_v1 }
  0xf0 PF: > { %v2479_v2 = vld [vmem:[#allocation10 + $0x4] ss:$12 sps:$4 sm:$0xff]   ;;  %v2481_v3 = vld [vmem:[#allocation10] ss:$12 sps:$4 sm:$0xff]   ;;  %v2980_v4 = vmov 0   ;;  %v2514_v33 = vld [vmem:[%s3353_s19 + $0x8] sm:$0xff]   ;;  %v546_v59 = vlaneseq }
  0xf1   : > { %745 = vmatprep.mubr.bf16.mxu0 %v2980_v4  ;;  %713 = vmatprep.subr.bf16.mxu0 %v2479_v2  ;;  %v2482_v5 = vld [vmem:[#allocation10 + $0x1c] ss:$12 sps:$4 sm:$0xff]   ;;  %v2484_v6 = vld [vmem:[#allocation10 + $0x18] ss:$12 sps:$4 sm:$0xff]   ;;  %v2485_v7 = vld [vmem:[#allocation10 + $0x34] ss:$12 sps:$4 sm:$0xff]  }
  0xf2   : > { %714 = vmatpush1.bf16.msra.mxu0 %v2481_v3  ;;  %v2487_v8 = vld [vmem:[#allocation10 + $0x30] ss:$12 sps:$4 sm:$0xff]   ;;  %v2488_v9 = vld [vmem:[#allocation10 + $0x4c] ss:$12 sps:$4 sm:$0xff]   ;;  %v2499_v10 = vld [vmem:[#allocation10 + $0x8] ss:$12 sps:$4 sm:$0xff]  }
  0xf3   : > { %715 = vmatprep.subr.bf16.mxu0 %v2482_v5  ;;  %v2490_v11 = vld [vmem:[#allocation10 + $0x48] ss:$12 sps:$4 sm:$0xff]   ;;  %2122 = vmatprep.subr.bf16.mxu1 %v2499_v10  ;;  %v2491_v12 = vld [vmem:[#allocation10 + $0x64] ss:$12 sps:$4 sm:$0xff]   ;;  %v2503_v13 = vld [vmem:[#allocation10 + $0x20] ss:$12 sps:$4 sm:$0xff]  }
  0xf4   : > { %2123 = vmatpush3.bf16.msra.mxu1 %v2499_v10  ;;  %v2505_v14 = vld [vmem:[%s3353_s19] sm:$0xff]   ;;  %v2506_v15 = vld [vmem:[#allocation10 + $0x38] ss:$12 sps:$4 sm:$0xff]   ;;  %v2493_v16 = vld [vmem:[#allocation10 + $0x60] ss:$12 sps:$4 sm:$0xff]   ;;  %v2981_v36 = vmov 0.0  }
  0xf5   : > { %2124 = vmatprep.subr.bf16.mxu1 %v2503_v13  ;;  %2138 = vmatprep.mubr.bf16.mxu1 %v2505_v14  ;;  %v2494_v17 = vld [vmem:[#allocation10 + $0x7c] ss:$12 sps:$4 sm:$0xff]   ;;  %v2496_v19 = vld [vmem:[#allocation10 + $0x78] ss:$12 sps:$4 sm:$0xff]   ;;  %v2497_v20 = vld [vmem:[#allocation10 + $0x94] ss:$12 sps:$4 sm:$0xff]  }
  0xf6   : > { %716 = vmatpush1.bf16.msra.mxu0 %v2484_v6  ;;  %v2510_v18 = vld [vmem:[#allocation10 + $0x50] ss:$12 sps:$4 sm:$0xff]   ;;  %v2515_v21 = vld [vmem:[#allocation10 + $0x68] ss:$12 sps:$4 sm:$0xff]   ;;  %v2501_v23 = vld [vmem:[#allocation10 + $0xac] ss:$12 sps:$4 sm:$0xff]  }
  0xf7   : > { %717 = vmatprep.subr.bf16.mxu0 %v2485_v7  ;;  %v2500_v22 = vld [vmem:[#allocation10 + $0x90] ss:$12 sps:$4 sm:$0xff]   ;;  %v2519_v24 = vld [vmem:[#allocation10 + $0x80] ss:$12 sps:$4 sm:$0xff]   ;;  %v2504_v25 = vld [vmem:[#allocation10 + $0xa8] ss:$12 sps:$4 sm:$0xff]  }
  0xf8   : > { %2125 = vmatpush3.bf16.msra.mxu1 %v2503_v13  ;;  %v3391_v26 = vld [vmem:[#allocation11 + $0x4] ss:$12 sps:$4 sm:$0xff]   ;;  %v3393_v28 = vld [vmem:[#allocation11] ss:$12 sps:$4 sm:$0xff]   ;;  %v3396_v29 = vld [vmem:[#allocation11 + $0x1c] ss:$12 sps:$4 sm:$0xff]  }
  0xf9   : > { %2126 = vmatprep.subr.bf16.mxu1 %v2506_v15  ;;  %v2524_v27 = vld [vmem:[#allocation10 + $0x98] ss:$12 sps:$4 sm:$0xff]   ;;  %v2528_v30 = vld [vmem:[#allocation10 + $0xb0] ss:$12 sps:$4 sm:$0xff]   ;;  %v3403_v32 = vld [vmem:[#allocation11 + $0x34] ss:$12 sps:$4 sm:$0xff]  }
  0xfa   : > { %718 = vmatpush1.bf16.msra.mxu0 %v2487_v8  ;;  %v3399_v31 = vld [vmem:[#allocation11 + $0x18] ss:$12 sps:$4 sm:$0xff]   ;;  %v3407_v34 = vld [vmem:[#allocation11 + $0x30] ss:$12 sps:$4 sm:$0xff]   ;;  %v3413_v37 = vld [vmem:[#allocation11 + $0x8] ss:$12 sps:$4 sm:$0xff]  }
  0xfb   : > { %719 = vmatprep.subr.bf16.mxu0 %v2488_v9  ;;  %v3410_v35 = vld [vmem:[#allocation11 + $0x4c] ss:$12 sps:$4 sm:$0xff]   ;;  %v3416_v38 = vld [vmem:[#allocation11 + $0x48] ss:$12 sps:$4 sm:$0xff]   ;;  %v2523_v39 = vld [vmem:[%s3353_s19 + $0x10] sm:$0xff]   ;;  %vm2982_vm0 = vmmov 0  }
  0xfc   : > { %2127 = vmatpush3.bf16.msra.mxu1 %v2506_v15  ;;  %v3421_v40 = vld [vmem:[#allocation11 + $0x64] ss:$12 sps:$4 sm:$0xff]   ;;  %v3424_v41 = vld [vmem:[#allocation11 + $0x20] ss:$12 sps:$4 sm:$0xff]   ;;  %v3431_v43 = vld [vmem:[#allocation11 + $0x7c] ss:$12 sps:$4 sm:$0xff]  }
  0xfd   : > { %2128 = vmatprep.subr.bf16.mxu1 %v2510_v18  ;;  %v3428_v42 = vld [vmem:[#allocation11 + $0x60] ss:$12 sps:$4 sm:$0xff]   ;;  %v3434_v44 = vld [vmem:[#allocation11 + $0x38] ss:$12 sps:$4 sm:$0xff]   ;;  %v3446_v48 = vld [vmem:[#allocation11 + $0x50] ss:$12 sps:$4 sm:$0xff]  }
  0xfe   : > { %720 = vmatpush1.bf16.msra.mxu0 %v2490_v11  ;;  %v2532_v45 = vld [vmem:[%s3353_s19 + $0x18] sm:$0xff]   ;;  %v3439_v46 = vld [vmem:[#allocation11 + $0x78] ss:$12 sps:$4 sm:$0xff]   ;;  %v3443_v47 = vld [vmem:[#allocation11 + $0x94] ss:$12 sps:$4 sm:$0xff]   ;;  %v547_v60 = vshrl.u32 %v546_v59, 7 }
  0xff   : > { %721 = vmatprep.subr.bf16.mxu0 %v2491_v12  ;;  %v3452_v49 = vld [vmem:[#allocation11 + $0x90] ss:$12 sps:$4 sm:$0xff]   ;;  %v3455_v50 = vld [vmem:[#allocation11 + $0xac] ss:$12 sps:$4 sm:$0xff]   ;;  %v3458_v51 = vld [vmem:[#allocation11 + $0x68] ss:$12 sps:$4 sm:$0xff]  }
 0x100   : > { %2129 = vmatpush3.bf16.msra.mxu1 %v2510_v18  ;;  %v3462_v52 = vld [vmem:[#allocation11 + $0xa8] ss:$12 sps:$4 sm:$0xff]   ;;  %v3465_v53 = vld [vmem:[#allocation2] sm:$0xff]  ;;  %v3486_v58 = vld [vmem:[#allocation11 + $0xb0] ss:$12 sps:$4 sm:$0xff]   ;;  %v556_v61 = vsub.s32 2, %v547_v60 }
 0x101   : > { %2130 = vmatprep.subr.bf16.mxu1 %v2515_v21  ;;  %v3467_v54 = vld [vmem:[#allocation2 + $0x8] sm:$0xff]  ;;  %v3479_v57 = vld [vmem:[#allocation11 + $0x98] ss:$12 sps:$4 sm:$0xff]   ;;  %s3899_s24 = sld [smem:[#allocation40_spill]]  ;;  %v548_v15 = vsub.s32 0, %v547_v60  ;;  %s3900_s29 = sld [smem:[#allocation41_spill]] }
 0x102   : > { %722 = vmatpush1.bf16.msra.mxu0 %v2493_v16  ;;  %v3471_v55 = vld [vmem:[#allocation11 + $0x80] ss:$12 sps:$4 sm:$0xff]   ;;  %v922_v56 = vpack.c.bf16 %v3467_v54, %v3465_v53  ;;  %v552_v16 = vsub.s32 1, %v547_v60 }
 0x103   : > { %723 = vmatprep.subr.bf16.mxu0 %v2494_v17 }
 0x104   : > { %2131 = vmatpush3.bf16.msra.mxu1 %v2515_v21 }
 0x105   : > { %2132 = vmatprep.subr.bf16.mxu1 %v2519_v24 }
 0x106   : > { %724 = vmatpush1.bf16.msra.mxu0 %v2496_v19 }
 0x107   : > { %725 = vmatprep.subr.bf16.mxu0 %v2497_v20  ;;  %v544_v62 = vld [vmem:[%s3899_s24] sm:$0x7] }
 0x108   : > { %2133 = vmatpush3.bf16.msra.mxu1 %v2519_v24  ;;  %v557_v63 = vrot.slane %v544_v62, %v556_v61  ;;  %v3538_v17 = vrot.slane %v544_v62, %v548_v15  ;;  %v3540_v19 = vrot.slane %v544_v62, %v552_v16 }
 0x109   : > { %2134 = vmatprep.subr.bf16.mxu1 %v2524_v27 }
 0x10a   : > { %726 = vmatpush1.bf16.msra.mxu0 %v2500_v22 }
 0x10b   : > { %727 = vmatprep.subr.bf16.mxu0 %v2501_v23 }
 0x10c   : > { %2135 = vmatpush3.bf16.msra.mxu1 %v2524_v27 }
 0x10d   : > { %2136 = vmatprep.subr.bf16.mxu1 %v2528_v30 }
 0x10e   : > { %728 = vmatpush1.bf16.msra.mxu0 %v2504_v25 }
 0x10f   : > { %1051 = vmatprep.subr.bf16.mxu0 %v3391_v26 }
 0x110   : > { %2137 = vmatpush3.bf16.msra.mxu1 %v2528_v30 }
 0x111   : > { %746 = vmatmul.mubr.bf16.vlgmr.msra.gmra.mrb[0].mxu0 %v2505_v14  ;;  %2146 = vmatprep.subr.bf16.mxu1 %v2981_v36 }
 0x112   : > { %1052 = vmatpush1.bf16.msra.mxu0 %v3393_v28  ;;  %755 = vmatprep.mubr.bf16.mxu0 %v2980_v4 }
 0x113   : > { %1053 = vmatprep.subr.bf16.mxu0 %v3396_v29  ;;  %2139 = vmatmul.mubr.bf16.vlgmr.msra.gmra.mrb[0].mxu1 %v2514_v33 }
 0x114   : > { %2147 = vmatpush3.bf16.msra.mxu1 %v3413_v37  ;;  %2142 = vmatprep.mubr.bf16.mxu1 %v2523_v39 }
 0x115   : > { %2148 = vmatprep.subr.bf16.mxu1 %v2981_v36 }
 0x116   : > { %1054 = vmatpush1.bf16.msra.mxu0 %v3399_v31 }
 0x117   : > { %1055 = vmatprep.subr.bf16.mxu0 %v3403_v32 }
 0x118   : > { %2149 = vmatpush3.bf16.msra.mxu1 %v3424_v41 }
 0x119   : > { %756 = vmatmul.mubr.bf16.gmra.mrb[4].mxu0 %v2514_v33  ;;  %2150 = vmatprep.subr.bf16.mxu1 %v2981_v36 }
 0x11a   : > { %1056 = vmatpush1.bf16.msra.mxu0 %v3407_v34  ;;  %765 = vmatprep.mubr.bf16.mxu0 %v2980_v4 }
 0x11b   : > { %1057 = vmatprep.subr.bf16.mxu0 %v3410_v35  ;;  %2143 = vmatmul.mubr.bf16.gmra.mrb[4].mxu1 %v2532_v45 }
 0x11c   : > { %2151 = vmatpush3.bf16.msra.mxu1 %v3434_v44  ;;  %2162 = vmatprep.mubr.msk.bf16.mxu1 %vm2982_vm0, %v2981_v36 }
 0x11d   : > { %2152 = vmatprep.subr.bf16.mxu1 %v2981_v36 }
 0x11e   : > { %1058 = vmatpush1.bf16.msra.mxu0 %v3416_v38 }
 0x11f   : > { %1059 = vmatprep.subr.bf16.mxu0 %v3421_v40 }
 0x120   : > { %2153 = vmatpush3.bf16.msra.mxu1 %v3446_v48 }
 0x121   : > { %766 = vmatmul.mubr.bf16.gmra.mrb[8].mxu0 %v2523_v39  ;;  %2154 = vmatprep.subr.bf16.mxu1 %v2981_v36 }
 0x122   : > { %1060 = vmatpush1.bf16.msra.mxu0 %v3428_v42  ;;  %775 = vmatprep.mubr.bf16.mxu0 %v2980_v4 }
 0x123   : > { %1061 = vmatprep.subr.bf16.mxu0 %v3431_v43 }
 0x124   : > { %2155 = vmatpush3.bf16.msra.mxu1 %v3458_v51 }
 0x125   : > { %2156 = vmatprep.subr.bf16.mxu1 %v2981_v36 }
 0x126   : > { %1062 = vmatpush1.bf16.msra.mxu0 %v3439_v46 }
 0x127   : > { %1063 = vmatprep.subr.bf16.mxu0 %v3443_v47 }
 0x128   : > { %2157 = vmatpush3.bf16.msra.mxu1 %v3471_v55 }
 0x129   : > { %776 = vmatmul.mubr.bf16.gmra.mrb[12].mxu0 %v2532_v45  ;;  %2158 = vmatprep.subr.bf16.mxu1 %v2981_v36 }
 0x12a   : > { %1064 = vmatpush1.bf16.msra.mxu0 %v3452_v49  ;;  %1083 = vmatprep.mubr.bf16.mxu0 %v2980_v4 }
 0x12b   : > { %1065 = vmatprep.subr.bf16.mxu0 %v3455_v50 }
 0x12c   : > { %2159 = vmatpush3.bf16.msra.mxu1 %v3479_v57 }
 0x12d   : > { %2160 = vmatprep.subr.bf16.mxu1 %v2981_v36 }
 0x12e   : > { %1066 = vmatpush1.bf16.msra.mxu0 %v3462_v52 }
 0x12f   : > { %1188 = vmatprep.subr.bf16.mxu0 %v3391_v26 }
 0x130   : > { %2161 = vmatpush3.bf16.msra.mxu1 %v3486_v58 }
 0x131   : > { %1084 = vmatmul.mubr.bf16.vlgmr.msra.gmra.mrb[0].mxu0 %v922_v56  ;;  %2166 = vmatprep.subr.bf16.mxu1 %v2981_v36 }
 0x132   : > { %1189 = vmatpush1.bf16.msra.mxu0 %v3393_v28  ;;  %1220 = vmatprep.mubr.bf16.mxu0 %v2980_v4 }
 0x133   : > { %1190 = vmatprep.subr.bf16.mxu0 %v3396_v29  ;;  %2163 = vmatmul.mubr.bf16.vlgmr.msra.gmra.mrb[8].mxu1 %v922_v56 }
 0x134   : > { %2167 = vmatpush3.bf16.msra.mxu1 %v3413_v37  ;;  %2182 = vmatprep.mubr.msk.bf16.mxu1 %vm2982_vm0, %v2981_v36 }
 0x135   : > { %2168 = vmatprep.subr.bf16.mxu1 %v2981_v36 }
 0x136   : > { %1191 = vmatpush1.bf16.msra.mxu0 %v3399_v31 }
 0x137   : > { %1192 = vmatprep.subr.bf16.mxu0 %v3403_v32 }
 0x138   : > { %2169 = vmatpush3.bf16.msra.mxu1 %v3424_v41 }
 0x139   : > { %2170 = vmatprep.subr.bf16.mxu1 %v2981_v36 }
 0x13a   : > { %1193 = vmatpush1.bf16.msra.mxu0 %v3407_v34 }
 0x13b   : > { %1194 = vmatprep.subr.bf16.mxu0 %v3410_v35 }
 0x13c   : > { %2171 = vmatpush3.bf16.msra.mxu1 %v3434_v44 }
 0x13d   : > { %2172 = vmatprep.subr.bf16.mxu1 %v2981_v36 }
 0x13e   : > { %1195 = vmatpush1.bf16.msra.mxu0 %v3416_v38 }
 0x13f   : > { %1196 = vmatprep.subr.bf16.mxu0 %v3421_v40 }
 0x140   : > { %2173 = vmatpush3.bf16.msra.mxu1 %v3446_v48 }
 0x141   : > { %2174 = vmatprep.subr.bf16.mxu1 %v2981_v36 }
 0x142   : > { %1197 = vmatpush1.bf16.msra.mxu0 %v3428_v42 }
 0x143   : > { %1198 = vmatprep.subr.bf16.mxu0 %v3431_v43 }
 0x144   : > { %2175 = vmatpush3.bf16.msra.mxu1 %v3458_v51 }
 0x145   : > { %2176 = vmatprep.subr.bf16.mxu1 %v2981_v36 }
 0x146   : > { %1199 = vmatpush1.bf16.msra.mxu0 %v3439_v46 }
 0x147   : > { %1200 = vmatprep.subr.bf16.mxu0 %v3443_v47 }
 0x148   : > { %2177 = vmatpush3.bf16.msra.mxu1 %v3471_v55 }
 0x149   : > { %2178 = vmatprep.subr.bf16.mxu1 %v2981_v36 }
 0x14a   : > { %1201 = vmatpush1.bf16.msra.mxu0 %v3452_v49 }
 0x14b   : > { %1202 = vmatprep.subr.bf16.mxu0 %v3455_v50 }
 0x14c   : > { %2179 = vmatpush3.bf16.msra.mxu1 %v3479_v57 }
 0x14d   : > { %2180 = vmatprep.subr.bf16.mxu1 %v2981_v36 }
 0x14e   : > { %1203 = vmatpush1.bf16.msra.mxu0 %v3462_v52 }
 0x14f   : > { %1326 = vmatprep.subr.bf16.mxu0 %v3391_v26 }
 0x150   : > { %2181 = vmatpush3.bf16.msra.mxu1 %v3486_v58 }
 0x151   : > { %2186 = vmatprep.subr.bf16.mxu1 %v2981_v36 }
 0x1e6   : > { %v2140_v0 = vpop.f32.mrb[0].mxu1 }
 0x1e7   : > { %v3526_v1 = vadd.f32 %v2140_v0, %v557_v63  ;;  %v820_v2 = vpop.f32.mrb[1].mxu1 }
 0x1e8   : > { %v2141_v3 = vpop.f32.mrb[2].mxu1 }
 0x1e9   : > { %v3528_v5 = vadd.f32 %v2141_v3, %v557_v63  ;;  %v823_v6 = vpop.f32.mrb[3].mxu1 }
 0x1ee   : > { %v2144_v7 = vpop.f32.mrb[4].mxu1 }
 0x1ef   : > { %v3530_v8 = vadd.f32 %v2144_v7, %v557_v63  ;;  %v836_v9 = vpop.f32.mrb[5].mxu1 }
 0x1f0   : > { %v3532_v10 = vadd.f32 %v836_v9, %v557_v63  ;;  %v2145_v11 = vpop.f32.mrb[6].mxu1 }
 0x1f1   : > { %v3534_v12 = vadd.f32 %v2145_v11, %v557_v63  ;;  %v839_v13 = vpop.f32.mrb[7].mxu1  ;;  %v3549_v11 = vld [vmem:[%s3900_s29] ss:$0 sm:$0xff] }
 0x1f2   : > { %v3536_v14 = vadd.f32 %v839_v13, %v557_v63 }
 0x204   : > { %v1085_v18 = vpop.f32.mrb[0].mxu0 }
 0x205   : > { %v2250_v20 = vadd.f32 %v1085_v18, %v3538_v17  ;;  %v1087_v21 = vpop.f32.mrb[1].mxu0 }
 0x206   : > { %v1089_v22 = vpop.f32.mrb[2].mxu0  ;;  %v2251_v27 = vadd.f32 %v1087_v21, %v3540_v19  ;;  %v1128_v56 = vpop.f32.mrb[8].mxu1  ;;  %v821_v21 = vadd.f32 %v820_v2, %v557_v63 }
 0x207   : > { %v2026_v23 = vmul.f32 -1.442695, %v2250_v20  ;;  %v2252_v24 = vadd.f32 %v1089_v22, %v3538_v17  ;;  %v1091_v25 = vpop.f32.mrb[3].mxu0  ;;  %v2164_v59 = vpop.f32.mrb[9].mxu1  ;;  %v1163_v16 = vadd.f32 %v3549_v11, %v1128_v56 }
 0x208   : > { %v2253_v33 = vadd.f32 %v1091_v25, %v3540_v19  ;;  %v2028_v39 = vmul.f32 -1.442695, %v2251_v27  ;;  %v1131_v60 = vpop.f32.mrb[10].mxu1  ;;  %v824_v25 = vadd.f32 %v823_v6, %v557_v63 }
 0x209   : > { %2547 = vpow2.f32 %v2026_v23  ;;  %v2027_v30 = vmul.f32 -1.442695, %v2252_v24  ;;  %v2165_v61 = vpop.f32.mrb[11].mxu1  ;;  %v1164_v23 = vadd.f32 %v3549_v11, %v1131_v60 }
 0x20a   : > { %v2029_v45 = vmul.f32 -1.442695, %v2253_v33 }
 0x20b   : > { %2549 = vpow2.f32 %v2027_v30 }
 0x20c   : > { %2551 = vpow2.f32 %v2028_v39 }
 0x20d   : > { %2553 = vpow2.f32 %v2029_v45 }
 0x213   : > { %v2548_v62 = vpop.eup %2547 }
 0x214   : > { %v1143_v0 = vadd.f32 1.0, %v2548_v62 }
 0x215   : > { %v2550_v3 = vpop.eup %2549 }
 0x216   : > { %2555 = vrcp.f32 %v1143_v0  ;;  %v1144_v7 = vadd.f32 1.0, %v2550_v3  ;;  %v2552_v9 = vpop.eup %2551 }
 0x217   : > { %v2554_v13 = vpop.eup %2553  ;;  %v1157_v15 = vadd.f32 1.0, %v2552_v9 }
 0x218   : > { %2557 = vrcp.f32 %v1144_v7  ;;  %v1158_v18 = vadd.f32 1.0, %v2554_v13 }
 0x219   : > { %2559 = vrcp.f32 %v1157_v15 }
 0x21a   : > { %2561 = vrcp.f32 %v1158_v18 }
 0x220   : > { %v2556_v20 = vpop.eup %2555 }
 0x221   : > { %v1165_v22 = vmul.f32 %v2556_v20, %v1163_v16 }
 0x222   : > { %v2558_v24 = vpop.eup %2557 }
 0x223   : > { %v1167_v27 = vadd.f32 %v1165_v22, %v821_v21  ;;  %v1166_v30 = vmul.f32 %v2558_v24, %v1164_v23  ;;  %v2560_v39 = vpop.eup %2559 }
 0x224   : > { %v2562_v45 = vpop.eup %2561  ;;  %v1171_v59 = vsub.f32 1.0, %v2560_v39  ;;  %v1175_v2 = vmul.f32 %v2560_v39, %v3465_v53 }
 0x225   : > { %2563 = vtanh.f32 %v1167_v27  ;;  %v1168_v33 = vadd.f32 %v1166_v30, %v824_v25  ;;  %v1172_v56 = vsub.f32 1.0, %v2562_v45  ;;  %v1176_v60 = vmul.f32 %v2562_v45, %v3467_v54 }
 0x227   : > { %2565 = vtanh.f32 %v1168_v33 }
 0x22f   : > { %v2564_v61 = vpop.eup %2563 }
 0x230   : > { %v1173_v62 = vmul.f32 %v2564_v61, %v1171_v59 }
 0x231   : > { %v2566_v0 = vpop.eup %2565 }
 0x232   : > { %v1174_v3 = vmul.f32 %v2566_v0, %v1172_v56  ;;  %v3555_v7 = vadd.f32 %v1175_v2, %v1173_v62 }
 0x234   : > { %v3557_v63 = vadd.f32 %v1176_v60, %v1174_v3 }
 0x236   : > { %v1179_v6 = vpack.c.bf16 %v3557_v63, %v3555_v7 }
 0x238   : > { %1180 = vst [vmem:[#allocation3] sm:$0xff] %v1179_v6  ;;  %1221 = vmatmul.mubr.bf16.vlgmr.msra.gmra.mrb[4].mxu0 %v1179_v6  ;;  %2183 = vmatmul.mubr.bf16.vlgmr.msra.gmra.mrb[12].mxu1 %v1179_v6 }
 0x239   : > { %1327 = vmatpush1.bf16.msra.mxu0 %v3393_v28  ;;  %2187 = vmatpush3.bf16.msra.mxu1 %v3413_v37 }
 0x23a   : > { %1328 = vmatprep.subr.bf16.mxu0 %v3396_v29  ;;  %2188 = vmatprep.subr.bf16.mxu1 %v2981_v36 }
 0x23b   : > { %1358 = vmatprep.mubr.bf16.mxu0 %v2980_v4  ;;  %2202 = vmatprep.mubr.msk.bf16.mxu1 %vm2982_vm0, %v2981_v36 }
 0x23d   : > { %1329 = vmatpush1.bf16.msra.mxu0 %v3399_v31  ;;  %2189 = vmatpush3.bf16.msra.mxu1 %v3424_v41 }
 0x23e   : > { %1330 = vmatprep.subr.bf16.mxu0 %v3403_v32  ;;  %2190 = vmatprep.subr.bf16.mxu1 %v2981_v36 }
 0x241   : > { %1331 = vmatpush1.bf16.msra.mxu0 %v3407_v34  ;;  %2191 = vmatpush3.bf16.msra.mxu1 %v3434_v44 }
 0x242   : > { %1332 = vmatprep.subr.bf16.mxu0 %v3410_v35  ;;  %2192 = vmatprep.subr.bf16.mxu1 %v2981_v36 }
 0x245   : > { %1333 = vmatpush1.bf16.msra.mxu0 %v3416_v38  ;;  %2193 = vmatpush3.bf16.msra.mxu1 %v3446_v48 }
 0x246   : > { %1334 = vmatprep.subr.bf16.mxu0 %v3421_v40  ;;  %2194 = vmatprep.subr.bf16.mxu1 %v2981_v36 }
 0x249   : > { %1335 = vmatpush1.bf16.msra.mxu0 %v3428_v42  ;;  %2195 = vmatpush3.bf16.msra.mxu1 %v3458_v51 }
 0x24a   : > { %1336 = vmatprep.subr.bf16.mxu0 %v3431_v43  ;;  %2196 = vmatprep.subr.bf16.mxu1 %v2981_v36 }
 0x24d   : > { %1337 = vmatpush1.bf16.msra.mxu0 %v3439_v46  ;;  %2197 = vmatpush3.bf16.msra.mxu1 %v3471_v55 }
 0x24e   : > { %1338 = vmatprep.subr.bf16.mxu0 %v3443_v47  ;;  %2198 = vmatprep.subr.bf16.mxu1 %v2981_v36 }
 0x251   : > { %1339 = vmatpush1.bf16.msra.mxu0 %v3452_v49  ;;  %2199 = vmatpush3.bf16.msra.mxu1 %v3479_v57 }
 0x252   : > { %1340 = vmatprep.subr.bf16.mxu0 %v3455_v50  ;;  %2200 = vmatprep.subr.bf16.mxu1 %v2981_v36 }
 0x255   : > { %1341 = vmatpush1.bf16.msra.mxu0 %v3462_v52  ;;  %2201 = vmatpush3.bf16.msra.mxu1 %v3486_v58 }
 0x256   : > { %1464 = vmatprep.subr.bf16.mxu0 %v3391_v26  ;;  %2206 = vmatprep.subr.bf16.mxu1 %v2981_v36 }
 0x30b   : > { %v1222_v53 = vpop.f32.mrb[4].mxu0  ;;  %v1265_v54 = vpop.f32.mrb[12].mxu1 }
 0x30c   : > { %v2254_v9 = vadd.f32 %v1222_v53, %v3538_v17  ;;  %v1224_v13 = vpop.f32.mrb[5].mxu0  ;;  %v2184_v15 = vpop.f32.mrb[13].mxu1  ;;  %v1300_v2 = vadd.f32 %v3549_v11, %v1265_v54 }
 0x30d   : > { %v1226_v16 = vpop.f32.mrb[6].mxu0  ;;  %v1268_v18 = vpop.f32.mrb[14].mxu1  ;;  %v2255_v24 = vadd.f32 %v1224_v13, %v3540_v19 }
 0x30e   : > { %v2030_v20 = vmul.f32 -1.442695, %v2254_v9  ;;  %v2256_v21 = vadd.f32 %v1226_v16, %v3538_v17  ;;  %v1228_v22 = vpop.f32.mrb[7].mxu0  ;;  %v2185_v23 = vpop.f32.mrb[15].mxu1  ;;  %v1301_v6 = vadd.f32 %v3549_v11, %v1268_v18 }
 0x30f   : > { %v2257_v26 = vadd.f32 %v1228_v22, %v3540_v19  ;;  %v2032_v27 = vmul.f32 -1.442695, %v2255_v24 }
 0x310   : > { %2567 = vpow2.f32 %v2030_v20  ;;  %v2031_v25 = vmul.f32 -1.442695, %v2256_v21 }
 0x311   : > { %v2033_v30 = vmul.f32 -1.442695, %v2257_v26 }
 0x312   : > { %2569 = vpow2.f32 %v2031_v25 }
 0x313   : > { %2571 = vpow2.f32 %v2032_v27 }
 0x314   : > { %2573 = vpow2.f32 %v2033_v30 }
 0x31a   : > { %v2568_v33 = vpop.eup %2567 }
 0x31b   : > { %v1280_v39 = vadd.f32 1.0, %v2568_v33 }
 0x31c   : > { %v2570_v45 = vpop.eup %2569 }
 0x31d   : > { %2575 = vrcp.f32 %v1280_v39  ;;  %v1281_v59 = vadd.f32 1.0, %v2570_v45  ;;  %v2572_v61 = vpop.eup %2571 }
 0x31e   : > { %v2574_v56 = vpop.eup %2573  ;;  %v1294_v62 = vadd.f32 1.0, %v2572_v61 }
 0x31f   : > { %2577 = vrcp.f32 %v1281_v59  ;;  %v1295_v0 = vadd.f32 1.0, %v2574_v56 }
 0x320   : > { %2579 = vrcp.f32 %v1294_v62 }
 0x321   : > { %2581 = vrcp.f32 %v1295_v0 }
 0x327   : > { %v2576_v3 = vpop.eup %2575 }
 0x328   : > { %v1302_v60 = vmul.f32 %v2576_v3, %v1300_v2 }
 0x329   : > { %v2578_v53 = vpop.eup %2577 }
 0x32a   : > { %v1304_v9 = vadd.f32 %v1302_v60, %v3526_v1  ;;  %v1303_v13 = vmul.f32 %v2578_v53, %v1301_v6  ;;  %v2580_v16 = vpop.eup %2579 }
 0x32b   : > { %v2582_v20 = vpop.eup %2581  ;;  %v1308_v21 = vsub.f32 1.0, %v2580_v16  ;;  %v1312_v24 = vmul.f32 %v2580_v16, %v3555_v7 }
 0x32c   : > { %2583 = vtanh.f32 %v1304_v9  ;;  %v1305_v15 = vadd.f32 %v1303_v13, %v3528_v5  ;;  %v1309_v54 = vsub.f32 1.0, %v2582_v20  ;;  %v1313_v18 = vmul.f32 %v2582_v20, %v3557_v63 }
 0x32e   : > { %2585 = vtanh.f32 %v1305_v15 }
 0x336   : > { %v2584_v22 = vpop.eup %2583 }
 0x337   : > { %v1310_v23 = vmul.f32 %v2584_v22, %v1308_v21 }
 0x338   : > { %v2586_v25 = vpop.eup %2585 }
 0x339   : > { %v1311_v26 = vmul.f32 %v2586_v25, %v1309_v54  ;;  %v3606_v27 = vadd.f32 %v1312_v24, %v1310_v23 }
 0x33b   : > { %v3608_v1 = vadd.f32 %v1313_v18, %v1311_v26 }
 0x33d   : > { %v1316_v5 = vpack.c.bf16 %v3608_v1, %v3606_v27 }
 0x33f   : > { %1318 = vst [vmem:[#allocation3 + $0x8] sm:$0xff] %v1316_v5  ;;  %1359 = vmatmul.mubr.bf16.vlgmr.msra.gmra.mrb[8].mxu0 %v1316_v5  ;;  %2203 = vmatmul.mubr.bf16.vlgmr.msra.gmra.mrb[16].mxu1 %v1316_v5 }
 0x340   : > { %1465 = vmatpush1.bf16.msra.mxu0 %v3393_v28  ;;  %2207 = vmatpush3.bf16.msra.mxu1 %v3413_v37 }
 0x341   : > { %1466 = vmatprep.subr.bf16.mxu0 %v3396_v29  ;;  %2208 = vmatprep.subr.bf16.mxu1 %v2981_v36 }
 0x342   : > { %1496 = vmatprep.mubr.bf16.mxu0 %v2980_v4  ;;  %2222 = vmatprep.mubr.msk.bf16.mxu1 %vm2982_vm0, %v2981_v36 }
 0x344   : > { %1467 = vmatpush1.bf16.msra.mxu0 %v3399_v31  ;;  %2209 = vmatpush3.bf16.msra.mxu1 %v3424_v41 }
 0x345   : > { %1468 = vmatprep.subr.bf16.mxu0 %v3403_v32  ;;  %2210 = vmatprep.subr.bf16.mxu1 %v2981_v36 }
 0x348   : > { %1469 = vmatpush1.bf16.msra.mxu0 %v3407_v34  ;;  %2211 = vmatpush3.bf16.msra.mxu1 %v3434_v44 }
 0x349   : > { %1470 = vmatprep.subr.bf16.mxu0 %v3410_v35  ;;  %2212 = vmatprep.subr.bf16.mxu1 %v2981_v36 }
 0x34c   : > { %1471 = vmatpush1.bf16.msra.mxu0 %v3416_v38  ;;  %2213 = vmatpush3.bf16.msra.mxu1 %v3446_v48 }
 0x34d   : > { %1472 = vmatprep.subr.bf16.mxu0 %v3421_v40  ;;  %2214 = vmatprep.subr.bf16.mxu1 %v2981_v36 }
 0x350   : > { %1473 = vmatpush1.bf16.msra.mxu0 %v3428_v42  ;;  %2215 = vmatpush3.bf16.msra.mxu1 %v3458_v51 }
 0x351   : > { %1474 = vmatprep.subr.bf16.mxu0 %v3431_v43  ;;  %2216 = vmatprep.subr.bf16.mxu1 %v2981_v36 }
 0x354   : > { %1475 = vmatpush1.bf16.msra.mxu0 %v3439_v46  ;;  %2217 = vmatpush3.bf16.msra.mxu1 %v3471_v55 }
 0x355   : > { %1476 = vmatprep.subr.bf16.mxu0 %v3443_v47  ;;  %2218 = vmatprep.subr.bf16.mxu1 %v2981_v36 }
 0x358   : > { %1477 = vmatpush1.bf16.msra.mxu0 %v3452_v49  ;;  %2219 = vmatpush3.bf16.msra.mxu1 %v3479_v57 }
 0x359   : > { %1478 = vmatprep.subr.bf16.mxu0 %v3455_v50  ;;  %2220 = vmatprep.subr.bf16.mxu1 %v2981_v36 }
 0x35c   : > { %1479 = vmatpush1.bf16.msra.mxu0 %v3462_v52  ;;  %2221 = vmatpush3.bf16.msra.mxu1 %v3486_v58 }
 0x412   : > { %v1360_v4 = vpop.f32.mrb[8].mxu0  ;;  %v1403_v28 = vpop.f32.mrb[16].mxu1 }
 0x413   : > { %v2258_v29 = vadd.f32 %v1360_v4, %v3538_v17  ;;  %v1362_v31 = vpop.f32.mrb[9].mxu0  ;;  %v2204_v32 = vpop.f32.mrb[17].mxu1  ;;  %v1438_v57 = vadd.f32 %v3549_v11, %v1403_v28 }
 0x414   : > { %v1364_v34 = vpop.f32.mrb[10].mxu0  ;;  %v1406_v35 = vpop.f32.mrb[18].mxu1  ;;  %v2259_v42 = vadd.f32 %v1362_v31, %v3540_v19 }
 0x415   : > { %v2034_v37 = vmul.f32 -1.442695, %v2258_v29  ;;  %v2260_v38 = vadd.f32 %v1364_v34, %v3538_v17  ;;  %v1366_v40 = vpop.f32.mrb[11].mxu0  ;;  %v2205_v41 = vpop.f32.mrb[19].mxu1  ;;  %v1439_v30 = vadd.f32 %v3549_v11, %v1406_v35 }
 0x416   : > { %v2261_v43 = vadd.f32 %v1366_v40, %v3540_v19  ;;  %v2036_v44 = vmul.f32 -1.442695, %v2259_v42 }
 0x417   : > { %2587 = vpow2.f32 %v2034_v37  ;;  %v2035_v36 = vmul.f32 -1.442695, %v2260_v38 }
 0x418   : > { %v2037_v46 = vmul.f32 -1.442695, %v2261_v43 }
 0x419   : > { %2589 = vpow2.f32 %v2035_v36 }
 0x41a   : > { %2591 = vpow2.f32 %v2036_v44 }
 0x41b   : > { %2593 = vpow2.f32 %v2037_v46 }
 0x421   : > { %v2588_v47 = vpop.eup %2587 }
 0x422   : > { %v1418_v48 = vadd.f32 1.0, %v2588_v47 }
 0x423   : > { %v2590_v49 = vpop.eup %2589 }
 0x424   : > { %2595 = vrcp.f32 %v1418_v48  ;;  %v1419_v50 = vadd.f32 1.0, %v2590_v49  ;;  %v2592_v51 = vpop.eup %2591 }
 0x425   : > { %v2594_v52 = vpop.eup %2593  ;;  %v1432_v55 = vadd.f32 1.0, %v2592_v51 }
 0x426   : > { %2597 = vrcp.f32 %v1419_v50  ;;  %v1433_v58 = vadd.f32 1.0, %v2594_v52 }
 0x427   : > { %2599 = vrcp.f32 %v1432_v55 }
 0x428   : > { %2601 = vrcp.f32 %v1433_v58 }
 0x42e   : > { %v2596_v7 = vpop.eup %2595 }
 0x42f   : > { %v1440_v63 = vmul.f32 %v2596_v7, %v1438_v57 }
 0x430   : > { %v2598_v33 = vpop.eup %2597 }
 0x431   : > { %v1442_v39 = vadd.f32 %v1440_v63, %v3532_v10  ;;  %v1441_v45 = vmul.f32 %v2598_v33, %v1439_v30  ;;  %v2600_v61 = vpop.eup %2599 }
 0x432   : > { %v2602_v56 = vpop.eup %2601  ;;  %v1446_v62 = vsub.f32 1.0, %v2600_v61  ;;  %v1450_v60 = vmul.f32 %v2600_v61, %v3606_v27 }
 0x433   : > { %2603 = vtanh.f32 %v1442_v39  ;;  %v1443_v59 = vadd.f32 %v1441_v45, %v3536_v14  ;;  %v1447_v0 = vsub.f32 1.0, %v2602_v56  ;;  %v1451_v9 = vmul.f32 %v2602_v56, %v3608_v1 }
 0x435   : > { %2605 = vtanh.f32 %v1443_v59 }
 0x43d   : > { %v2604_v2 = vpop.eup %2603 }
 0x43e   : > { %v1448_v3 = vmul.f32 %v2604_v2, %v1446_v62 }
 0x43f   : > { %v2606_v6 = vpop.eup %2605 }
 0x440   : > { %v1449_v53 = vmul.f32 %v2606_v6, %v1447_v0  ;;  %v1452_v13 = vadd.f32 %v1450_v60, %v1448_v3 }
 0x442   : > { %v1453_v10 = vadd.f32 %v1451_v9, %v1449_v53 }
 0x444   : > { %v1454_v15 = vpack.c.bf16 %v1453_v10, %v1452_v13 }
 0x446   : > { %1456 = vst [vmem:[#allocation3 + $0x10] sm:$0xff] %v1454_v15  ;;  %1497 = vmatmul.mubr.bf16.vlgmr.msra.gmra.mrb[12].mxu0 %v1454_v15  ;;  %2223 = vmatmul.mubr.bf16.vlgmr.msra.gmra.mrb[20].mxu1 %v1454_v15 }
 0x519   : > { %v1498_v14 = vpop.f32.mrb[12].mxu0  ;;  %v1541_v16 = vpop.f32.mrb[20].mxu1 }
 0x51a   : > { %v2262_v20 = vadd.f32 %v1498_v14, %v3538_v17  ;;  %v1500_v21 = vpop.f32.mrb[13].mxu0  ;;  %v2224_v22 = vpop.f32.mrb[21].mxu1  ;;  %v1576_v38 = vadd.f32 %v3549_v11, %v1541_v16 }
 0x51b   : > { %v1502_v54 = vpop.f32.mrb[14].mxu0  ;;  %v1544_v23 = vpop.f32.mrb[22].mxu1  ;;  %v2263_v27 = vadd.f32 %v1500_v21, %v3540_v19 }
 0x51c   : > { %v2038_v24 = vmul.f32 -1.442695, %v2262_v20  ;;  %v2264_v25 = vadd.f32 %v1502_v54, %v3538_v17  ;;  %v1504_v26 = vpop.f32.mrb[15].mxu0  ;;  %v2225_v18 = vpop.f32.mrb[23].mxu1 }
 0x51d   : > { %v2265_v5 = vadd.f32 %v1504_v26, %v3540_v19  ;;  %v2040_v4 = vmul.f32 -1.442695, %v2263_v27  ;;  %v1577_v19 = vadd.f32 %v3549_v11, %v1544_v23 }
 0x51e   : > { %2607 = vpow2.f32 %v2038_v24  ;;  %v2039_v1 = vmul.f32 -1.442695, %v2264_v25 }
 0x51f   : > { %v2041_v28 = vmul.f32 -1.442695, %v2265_v5 }
 0x520   : > { %2609 = vpow2.f32 %v2039_v1 }
 0x521   : > { %2611 = vpow2.f32 %v2040_v4 }
 0x522   : > { %2613 = vpow2.f32 %v2041_v28 }
 0x528   : > { %v2608_v29 = vpop.eup %2607 }
 0x529   : > { %v1556_v31 = vadd.f32 1.0, %v2608_v29 }
 0x52a   : > { %v2610_v32 = vpop.eup %2609 }
 0x52b   : > { %2615 = vrcp.f32 %v1556_v31  ;;  %v1557_v34 = vadd.f32 1.0, %v2610_v32  ;;  %v2612_v17 = vpop.eup %2611 }
 0x52c   : > { %v2614_v35 = vpop.eup %2613  ;;  %v1570_v37 = vadd.f32 1.0, %v2612_v17 }
 0x52d   : > { %2617 = vrcp.f32 %v1557_v34  ;;  %v1571_v40 = vadd.f32 1.0, %v2614_v35 }
 0x52e   : > { %2619 = vrcp.f32 %v1570_v37 }
 0x52f   : > { %2621 = vrcp.f32 %v1571_v40 }
 0x535   : > { %v2616_v41 = vpop.eup %2615 }
 0x536   : > { %v1578_v42 = vmul.f32 %v2616_v41, %v1576_v38 }
 0x537   : > { %v2618_v36 = vpop.eup %2617 }
 0x538   : > { %v1580_v43 = vadd.f32 %v1578_v42, %v3530_v8  ;;  %v1579_v44 = vmul.f32 %v2618_v36, %v1577_v19  ;;  %v2620_v47 = vpop.eup %2619 }
 0x539   : > { %v2622_v48 = vpop.eup %2621  ;;  %v1584_v49 = vsub.f32 1.0, %v2620_v47  ;;  %v1588_v52 = vmul.f32 %v2620_v47, %v1452_v13 }
 0x53a   : > { %2623 = vtanh.f32 %v1580_v43  ;;  %v1581_v46 = vadd.f32 %v1579_v44, %v3534_v12  ;;  %v1585_v55 = vsub.f32 1.0, %v2622_v48  ;;  %v1589_v11 = vmul.f32 %v2622_v48, %v1453_v10 }
 0x53c   : > { %2625 = vtanh.f32 %v1581_v46 }
 0x544   : > { %v2624_v50 = vpop.eup %2623 }
 0x545   : > { %v1586_v51 = vmul.f32 %v2624_v50, %v1584_v49 }
 0x546   : > { %v2626_v57 = vpop.eup %2625 }
 0x547   : > { %v1590_v58 = vadd.f32 %v1588_v52, %v1586_v51  ;;  %v1587_v7 = vmul.f32 %v2626_v57, %v1585_v55 }
 0x549   : > { %1595 = vst [vmem:[#allocation2] sm:$0xff] %v1590_v58  ;;  %v1591_v63 = vadd.f32 %v1589_v11, %v1587_v7 }
 0x54b   : > { %v1592_v8 = vpack.c.bf16 %v1591_v63, %v1590_v58  ;;  %1596 = vst [vmem:[#allocation2 + $0x8] sm:$0xff] %v1591_v63 }
 0x54d   : > { %1594 = vst [vmem:[#allocation3 + $0x18] sm:$0xff] %v1592_v8 }
 0x54e PF: > { %v2627_v12 = vld [vmem:[%s3368_s10] sm:$0xff]   ;;  %v2628_v30 = vld [vmem:[%s3368_s10 + $0x8] sm:$0xff]   ;;  %v2629_v33 = vld [vmem:[%s3368_s10 + $0x10] sm:$0xff]   ;;  %s2983_s8 = smov [#allocation15]   ;;  %p3901_p5 = scmp.eq.s32.totalorder %s3105_s23, 3 }
 0x54f   : > { %2226 = vmatprep.subr.bf16.mxu0 %v2627_v12  ;;  %2282 = vmatprep.subr.bf16.mxu1 %v2627_v12  ;;  %v2630_v39 = vld [vmem:[%s3368_s10 + $0x18] sm:$0xff]   ;;  %v1597_v45 = vld [vmem:[#allocation3] sm:$0xff]  ;;  %v1599_v59 = vld [vmem:[#allocation3 + $0x10] sm:$0xff]  ;;  %s1784_s5 = sshll.u32 %s2983_s8, 4  ;;  %s1785_s5 = int_to_ptr.vmem [resolvable:$true] %s1784_s5 }
 0x550   : > { %2227 = vmatpush3.bf16.msra.mxu0 %v2627_v12  ;;  %2290 = vmatpush3.bf16.msra.mxu1 %v2627_v12  ;;  %v2631_v61 = vld [vmem:[%s3368_s10 + $0x20] sm:$0xff]   ;;  %v2632_v56 = vld [vmem:[%s3368_s10 + $0x28] sm:$0xff]   ;;  %v2633_v62 = vld [vmem:[%s3368_s10 + $0x30] sm:$0xff]   ;;  %s2779_s12 = scalar_lea.vmem %s1785_s5, 256  ;;  %p2786_p6 = scmp.lt.s32.totalorder %s1785_s5, %s1785_s5 }
 0x551   : > { %2228 = vmatprep.subr.bf16.mxu0 %v2628_v30  ;;  %2283 = vmatprep.subr.bf16.mxu1 %v2628_v30  ;;  %v2634_v2 = vld [vmem:[%s3368_s10 + $0x38] sm:$0xff]   ;;  %v1745_v60 = vld [vmem:[#allocation2] sm:$0xff]  ;;  %p2780_p2 = scmp.ne.s32.totalorder %s1785_s5, %s2779_s12  ;;  %p2787_p3 = scmp.lt.s32.totalorder %s2779_s12, %s2779_s12 }
 0x552   : > { %2242 = vmatprep.mubr.bf16.mxu0 %v1597_v45  ;;  %2246 = vmatprep.mubr.bf16.mxu1 %v1599_v59  ;;  %v1598_v0 = vld [vmem:[#allocation3 + $0x8] sm:$0xff]  ;;  %v1746_v6 = vld [vmem:[#allocation2 + $0x8] sm:$0xff]  ;;  %1747 = vst [vmem:[#allocation15] sm:$0xff] %v1745_v60 }
 0x553   : > { %1748 = vst [vmem:[#allocation15 + $0x8] sm:$0xff] %v1746_v6  ;;  %p2781_p0 = pnand %p2780_p2, %p3901_p5  ;;  %p2788_p11 = por %p2787_p3, %p2786_p6 }
 0x554   : > { %2229 = vmatpush3.bf16.msra.mxu0 %v2628_v30  ;;  %2291 = vmatpush3.bf16.msra.mxu1 %v2628_v30  ;;  %v1600_v3 = vld [vmem:[#allocation3 + $0x18] sm:$0xff] }
 0x555   : > { %2230 = vmatprep.subr.bf16.mxu0 %v2629_v33  ;;  %2284 = vmatprep.subr.bf16.mxu1 %v2629_v33  ;;  %p2782_p8 = pneg %p2781_p0 }
 0x557   : > { %p2789_p9 = pnand %p2788_p11, %p2782_p8 }
 0x558   : > { %2231 = vmatpush3.bf16.msra.mxu0 %v2629_v33  ;;  %2292 = vmatpush3.bf16.msra.mxu1 %v2629_v33 }
 0x559   : > { %2232 = vmatprep.subr.bf16.mxu0 %v2630_v39  ;;  %2285 = vmatprep.subr.bf16.mxu1 %v2630_v39 }
 0x55c   : > { %2233 = vmatpush3.bf16.msra.mxu0 %v2630_v39  ;;  %2293 = vmatpush3.bf16.msra.mxu1 %v2630_v39 }
 0x55d   : > { %2234 = vmatprep.subr.bf16.mxu0 %v2631_v61  ;;  %2286 = vmatprep.subr.bf16.mxu1 %v2631_v61 }
 0x560   : > { %2235 = vmatpush3.bf16.msra.mxu0 %v2631_v61  ;;  %2294 = vmatpush3.bf16.msra.mxu1 %v2631_v61 }
 0x561   : > { %2236 = vmatprep.subr.bf16.mxu0 %v2632_v56  ;;  %2287 = vmatprep.subr.bf16.mxu1 %v2632_v56 }
 0x564   : > { %2237 = vmatpush3.bf16.msra.mxu0 %v2632_v56  ;;  %2295 = vmatpush3.bf16.msra.mxu1 %v2632_v56 }
 0x565   : > { %2238 = vmatprep.subr.bf16.mxu0 %v2633_v62  ;;  %2288 = vmatprep.subr.bf16.mxu1 %v2633_v62 }
 0x568   : > { %2239 = vmatpush3.bf16.msra.mxu0 %v2633_v62  ;;  %2296 = vmatpush3.bf16.msra.mxu1 %v2633_v62 }
 0x569   : > { %2240 = vmatprep.subr.bf16.mxu0 %v2634_v2  ;;  %2289 = vmatprep.subr.bf16.mxu1 %v2634_v2 }
 0x56c   : > { %2241 = vmatpush3.bf16.msra.mxu0 %v2634_v2  ;;  %2297 = vmatpush3.bf16.msra.mxu1 %v2634_v2 }
 0x56f   : > { %2243 = vmatmul.mubr.bf16.vlgmr.msra.gmra.mrb[0].mxu0 %v1598_v0  ;;  %2247 = vmatmul.mubr.bf16.vlgmr.msra.gmra.mrb[0].mxu1 %v1600_v3 }
 0x570   : > { %2792 = shalt.err (!%p2789_p9)
}
 0x571   : > { %s3902_s9 = sld [smem:[#allocation44_spill]]  ;;  %p3903_p4 = pmov %p3901_p5 }
 0x577   : > { %s2793_s1 = scalar_lea.hbm %s3902_s9, 256 }
 0x578   : > { %p2794_p1 = scmp.ne.s32.totalorder %s3902_s9, %s2793_s1  ;;  %p2799_p12 = scmp.lt.u32.totalorder %s2793_s1, %s3902_s9 }
 0x57a   : > { %p2795_p7 = pnand %p2794_p1, %p3903_p4 }
 0x57c   : > { %p2796_p10 = pneg %p2795_p7 }
 0x57e   : > { %p2801_p13 = pnand %p2799_p12, %p2796_p10 }
 0x580   : > { %2804 = shalt.err (!%p2801_p13)
}
 0x581   : > { %s2984_s13 = smov 128   ;;  %s3904_s15 = sld [smem:[#allocation28_spill]]  ;;  %v2042_v53 = vld [vmem:[%s487_s28] ss:$0 sm:$0xff] }
 0x582   : > { %s3905_s24 = sld [smem:[#allocation27_spill]]  ;;  %s2985_s0 = smov 8  }
 0x583   : > { %p3906_p2 = pmov %p3903_p4  ;;  %s1768_s30 = sshll.u32 %s3385_s7, 4  ;;  %s3709_s30 = int_to_ptr.vmem [resolvable:$true] %s1768_s30 }
 0x584   : > { %s3909_s28 = sld [smem:[#allocation32_spill]]  ;;  %s3910_s17 = sld [smem:[#allocation43_spill]] }
 0x585   : > { %2316 = dma.vmem_to_hbm [thread:$0]  (%p3906_p2), %s1785_s5, 256, %s3902_s9, [#allocation16], %s2984_s13, %s2984_s13, %s2985_s0  }
 0x586   : > { %s3717_s19 = scalar_lea.sflag [#allocation7], %s477_s26  ;;  %s2805_s29 = scalar_lea.vmem %s3709_s30, 1024 }
 0x587   : > { %s2061_s8 = sshll.u32 %s3904_s15, 4  ;;  %p2806_p5 = scmp.ne.s32.totalorder %s3709_s30, %s2805_s29 }
 0x588   : > { %s1765_s12 = sadd.s32 %s3905_s24, %s2061_s8  ;;  %s2986_s8 = smov [#allocation14]  }
 0x589   : > { %s2054_s27 = sshll.u32 %s1765_s12, 7  ;;  %s2809_s12 = sshll.u32 %s2986_s8, 4  ;;  %s2810_s12 = int_to_ptr.vmem [resolvable:$false] %s2809_s12 }
 0x58a   : > { %s3911_s24 = smov %s3910_s17  ;;  %s3705_s15 = scalar_lea.hbm %s3910_s17, %s2054_s27 }
 0x58b   : > { %p3912_p0 = scmp.ne.s32.totalorder %s3909_s28, 0  ;;  %s2811_s10 = scalar_lea.vmem %s2810_s12, 2048 }
 0x58c   : > { %p2812_p3 = scmp.lt.s32.totalorder %s3709_s30, %s2810_s12  ;;  %p2813_p11 = scmp.lt.s32.totalorder %s2811_s10, %s2805_s29 }
 0x58d   : > { %p2807_p8 = pnand %p2806_p5, %p3912_p0 }
 0x58e   : > { %p2814_p9 = por %p2813_p11, %p2812_p3 }
 0x58f   : > { %p2808_p6 = pneg %p2807_p8 }
 0x591   : > { %p2815_p1 = pnand %p2814_p9, %p2808_p6 }
 0x642   : > { %v2244_v9 = vpop.f32.mrb[0].mxu0  ;;  %v2248_v13 = vpop.f32.mrb[0].mxu1 }
 0x643   : > { %v1715_v10 = vadd.f32 %v2244_v9, %v2042_v53  ;;  %v1731_v15 = vadd.f32 %v2248_v13, %v2042_v53  ;;  %v1706_v14 = vpop.f32.mrb[1].mxu0  ;;  %v1722_v16 = vpop.f32.mrb[1].mxu1 }
 0x644   : > { %v1707_v20 = vadd.f32 %v2042_v53, %v1706_v14  ;;  %v1723_v21 = vadd.f32 %v2042_v53, %v1722_v16  ;;  %v2245_v22 = vpop.f32.mrb[2].mxu0  ;;  %v2249_v54 = vpop.f32.mrb[2].mxu1 }
 0x645   : > { %1739 = vst [vmem:[%s3385_s7 + $0x10] sm:$0xff] %v1715_v10  ;;  %1743 = vst [vmem:[%s3385_s7 + $0x30] sm:$0xff] %v1731_v15  ;;  %v1718_v23 = vadd.f32 %v2245_v22, %v2042_v53  ;;  %v1734_v24 = vadd.f32 %v2249_v54, %v2042_v53  ;;  %v1709_v25 = vpop.f32.mrb[3].mxu0  ;;  %v1725_v26 = vpop.f32.mrb[3].mxu1 }
 0x646   : > { %1737 = vst [vmem:[%s3385_s7] sm:$0xff] %v1707_v20  ;;  %1741 = vst [vmem:[%s3385_s7 + $0x20] sm:$0xff] %v1723_v21  ;;  %v1710_v18 = vadd.f32 %v2042_v53, %v1709_v25  ;;  %v1726_v27 = vadd.f32 %v2042_v53, %v1725_v26 }
 0x647   : > { %1740 = vst [vmem:[%s3385_s7 + $0x18] sm:$0xff] %v1718_v23  ;;  %1744 = vst [vmem:[%s3385_s7 + $0x38] sm:$0xff] %v1734_v24 }
 0x648   : > { %1738 = vst [vmem:[%s3385_s7 + $0x8] sm:$0xff] %v1710_v18  ;;  %1742 = vst [vmem:[%s3385_s7 + $0x28] sm:$0xff] %v1726_v27 }
 0x649   : > { %2818 = shalt.err (!%p2815_p1)
}
 0x64a   : > { %s2819_s26 = scalar_lea.hbm %s3705_s15, 1024  ;;  %s2823_s1 = scalar_lea.hbm %s3911_s24, 4096 }
 0x64b   : > { %p2820_p4 = scmp.ne.s32.totalorder %s3705_s15, %s2819_s26  ;;  %p2824_p12 = scmp.lt.u32.totalorder %s3705_s15, %s3911_s24 }
 0x64c   : > { %p2825_p13 = scmp.lt.u32.totalorder %s2823_s1, %s2819_s26  ;;  %p2827_p5 = scmp.lt.u32.totalorder %s2819_s26, %s3705_s15 }
 0x64d   : > { %p2821_p7 = pnand %p2820_p4, %p3912_p0 }
 0x64e   : > { %p2826_p2 = por %p2825_p13, %p2824_p12 }
 0x64f   : > { %p2822_p10 = pneg %p2821_p7 }
 0x650   : > { %p2828_p8 = por %p2827_p5, %p2826_p2 }
 0x652   : > { %p2829_p6 = pnand %p2828_p8, %p2822_p10 }
 0x654   : > { %2832 = shalt.err (!%p2829_p6)
}
 0x655   : > { %s2987_s5 = smov 256   ;;  %p3913_p3 = scmp.eq.s32.totalorder %s3105_s23, 3 }
 0x656   : > { %2314 = dma.vmem_to_hbm [thread:$0]  (%p3912_p0), %s3709_s30, 1024, %s3705_s15, %s3717_s19, %s2984_s13, %s2987_s5, %s2985_s0  }
 0x657   : > { %2906 = dma.done.wait (%p3913_p3), [#allocation16], 256   ;;  %p3914_p11 = pmov %p3913_p3 }
 0x659   : > { %2908 = vsyncadd (%p3914_p11), [#allocation16], 4294967040 }
 0x65a PF: > { %s3915_s21 = sld [smem:[#allocation23_spill]]  ;;  %s3916_s17 = sld [smem:[#allocation33_spill]] }
 0x65b   : > { %p2350_p9 = scmp.ge.s32.totalorder %s2967_s22, 2 }
 0x660   : > { %s1803_s29 = sand.u32 1, %s3915_s21   ;;  %p3917_p1 = scmp.ne.s32.totalorder %s3916_s17, 0 }
 0x661   : > { %s1804_s28 = scalar_lea.sflag [#allocation7], %s1803_s29 }
 0x662   : > { %p2338_p4 = pnand %p2350_p9, %p3917_p1 }
 0x664   : > { %2910 = dma.done.wait (!%p2338_p4), %s1804_s28, 1024  }
 0x665   : > { %2912 = vsyncadd (!%p2338_p4), %s1804_s28, 4294966272  ;;  %s29_s22 = sadd.s32 1, %s2967_s22   ;;  %s3919_s30 = sld [smem:[#allocation24_spill]] }
 0x666   : > { %p3752_p7 = scmp.ge.s32.totalorder %s29_s22, 6   ;;  %s3920_s12 = sld [smem:[#allocation25_spill]] }
 0x667   : > { %s3921_s23 = sld [smem:[#allocation36_spill]]  ;;  %s3922_s0 = sld [smem:[#allocation26_spill]] }
 0x668   : > { %s3923_s17 = sld [smem:[#allocation37_spill]]  ;;  %s3924_s19 = sld [smem:[#allocation29_spill]] }
 0x669   : > { %s3925_s8 = sld [smem:[#allocation34_spill]]  ;;  %s3926_s21 = sld [smem:[#allocation35_spill]] }
 0x66a   : > { %s3928_s10 = smov %s2923_s11  ;;  %s3929_s11 = smov %s3215_s18 }
 0x66b   : > { %s3930_s13 = smov %s2935_s14  ;;  %s3932_s15 = smov %s2943_s16 }
 0x66c   : > { %s3934_s18 = smov %s2959_s20  ;;  %28 = sbr.rel (!%p3752_p7) target bundleno = 21 (0x15), region = 147 }
 0x66d   : > { %s3931_s14 = smov %s3921_s23  ;;  %s3933_s16 = smov %s3922_s0 }
 0x66f   : > { %s3935_s20 = smov %s3925_s8 }
 0x673   :  { %1809 = vsyncpa [#allocation6], 1 }
 0x674   :  { %1811 = vsyncpa [#allocation6 + $0x1], 1 }
 0x675   :  { %1812 = vsyncpa [#allocation9], 1 }
 0x676   :  { %1813 = vsyncpa [#allocation12], 1 }
 0x677   :  { %1814 = vsyncpa [#allocation7], 1 }
 0x678   :  { %1816 = vsyncpa [#allocation7 + $0x1], 1 }
 0x679   :  { %1817 = vsyncpa [#allocation16], 1 }

</bundles_post_ra>
